<compile_context>
chip_gen: v7x
topology: tpu7x:2x2x1
jax: 0.10.0
libtpu: 0.0.40
codegen_flags: <defaults>
</compile_context>

<pallas_src>
import jax
import jax.numpy as jnp
from jax import lax
from jax.experimental import pallas as pl
from jax.experimental.pallas import tpu as pltpu

_ATTN_EPS = 1e-6     # matches Attention.eps in the reference module
_NORM_EPS = 1e-12    # guards l2_norm against an all-zero pixel column
_BN_EPS = 1e-5
_HIGH = lax.Precision.HIGHEST

_AAM_TILE_CAP = 4096          # lanes per N tile (bf16 inputs -> ~12-16 MiB live VMEM)
_REC_TILE_CAP = 2048
_AAM_VMEM_LIMIT = 48 * 1024 * 1024   # < v7x 64 MiB physical; plenty of headroom everywhere


def _mm(a, b, dims):
    """Single-pass bf16 MXU matmul with f32 accumulation."""
    return lax.dot_general(
        a.astype(jnp.bfloat16), b.astype(jnp.bfloat16),
        dimension_numbers=(dims, ((), ())),
        preferred_element_type=jnp.float32)


def _pick_tile(n, cap):
    """Always-legal lane tiling: full extent if small, else a 128-multiple cap with a
    clipped (masked) last tile via a cdiv grid."""
    if n <= cap:
        return n, 1
    return cap, pl.cdiv(n, cap)


# ----------------------------------------------------------------------------------
# AttentionAggregationModule  (ConvBnRelu 1x1 + linear "tailor" attention fuse)
# ----------------------------------------------------------------------------------
def attention_aggregation_module(feats, kp):
    """feats: list of three (B, c_i, H, W) f32 NCHW tensors (channel-concat order)."""
    bsz, _, h, w = feats[0].shape
    n = h * w
    # bf16, lane-flattened inputs; no HBM concat — each map is its own kernel input.
    fs = [f.reshape(f.shape[0], f.shape[1], n).astype(jnp.bfloat16) for f in feats]
    c1, c2, c3 = fs[0].shape[1], fs[1].shape[1], fs[2].shape[1]
    cout, cq, cqp = kp["cout"], kp["cq"], kp["cqp"]
    cvk = cout + cqp

    # Split the 1x1-conv weight by input-feature group (avoids in-kernel lane slicing).
    wc = kp["wc"]
    wc1, wc2, wc3 = wc[:, :c1], wc[:, c1:c1 + c2], wc[:, c1 + c2:]

    tile_n, nt = _pick_tile(n, _AAM_TILE_CAP)

    def conv_bn_relu(f1_ref, f2_ref, f3_ref, wc1_ref, wc2_ref, wc3_ref, bns_ref, bnb_ref):
        # ConvBnRelu: 1x1 conv (bias=False, split over the 3 input groups) +
        # folded eval-mode BatchNorm + ReLU.
        acc = _mm(wc1_ref[...], f1_ref[0], ((1,), (0,)))
        acc += _mm(wc2_ref[...], f2_ref[0], ((1,), (0,)))
        acc += _mm(wc3_ref[...], f3_ref[0], ((1,), (0,)))
        return jnp.maximum(acc * bns_ref[...] + bnb_ref[...], 0.0)      # (cout, tn) f32

    # ---------------- call 1: attention statistics (reduction over N tiles) -----------
    def stats_kernel(f1_ref, f2_ref, f3_ref, wc1_ref, wc2_ref, wc3_ref,
                     bns_ref, bnb_ref, wvk_ref, bvk_ref,
                     mat_ref, ksum_ref, acc_mat, acc_ksum):
        t = pl.program_id(1)

        @pl.when(t == 0)
        def _init():
            acc_mat[...] = jnp.zeros_like(acc_mat)
            acc_ksum[...] = jnp.zeros_like(acc_ksum)

        feat = conv_bn_relu(f1_ref, f2_ref, f3_ref, wc1_ref, wc2_ref, wc3_ref,
                            bns_ref, bnb_ref)
        # Lane-validity mask for the clipped last tile (cdiv grid) — keeps garbage lanes
        # out of the accumulated statistics (and keeps V finite so 0-products stay 0).
        lane = lax.broadcasted_iota(jnp.int32, (1, feat.shape[-1]), 1)
        valid = lane < (n - t * tile_n)
        feat_b = jnp.where(valid, feat, 0.0).astype(jnp.bfloat16)

        # Fused V / K projection: one well-filled MXU pass (rows = cout + cqp).
        vk = _mm(wvk_ref[...], feat_b, ((1,), (0,))) + bvk_ref[...]
        v = vk[:cout]                                               # (cout, tn)
        k = vk[cout:]                                               # (cqp, tn), rows >= cq are 0
        kn = k * lax.rsqrt(jnp.sum(k * k, axis=0, keepdims=True) + _NORM_EPS)
        row = lax.broadcasted_iota(jnp.int32, kn.shape, 0)
        # "ones row" at index cq folds value_sum into the MXU contraction; then mask
        # invalid lanes so they contribute nothing.
        kn_aug = jnp.where(valid, jnp.where(row == cq, 1.0, kn), 0.0)
        acc_ksum[...] += jnp.sum(kn_aug, axis=1, keepdims=True)         # (cqp, 1): sum_n Kn
        acc_mat[...] += _mm(v, kn_aug, ((1,), (1,)))                    # (cout, cqp):
        #   cols [0:cq) = V·Kn^T ("matrix"^T), col cq = value_sum, rest = 0

        # Output blocks are resident across t (index map constant in t); cheap VMEM store.
        mat_ref[0] = acc_mat[...]
        ksum_ref[0] = acc_ksum[...]

    mat, ksum = pl.pallas_call(
        stats_kernel,
        out_shape=(jax.ShapeDtypeStruct((bsz, cout, cqp), jnp.float32),
                   jax.ShapeDtypeStruct((bsz, cqp, 1), jnp.float32)),
        grid_spec=pltpu.PrefetchScalarGridSpec(
            num_scalar_prefetch=0,
            grid=(bsz, nt),
            in_specs=[
                pl.BlockSpec((1, c1, tile_n), lambda b, t: (b, 0, t)),   # x_3s (bf16)
                pl.BlockSpec((1, c2, tile_n), lambda b, t: (b, 0, t)),   # x_2s (bf16)
                pl.BlockSpec((1, c3, tile_n), lambda b, t: (b, 0, t)),   # x_1s (bf16)
                pl.BlockSpec((cout, c1), lambda b, t: (0, 0)),           # wc group 1 (bf16)
                pl.BlockSpec((cout, c2), lambda b, t: (0, 0)),           # wc group 2 (bf16)
                pl.BlockSpec((cout, c3), lambda b, t: (0, 0)),           # wc group 3 (bf16)
                pl.BlockSpec((cout, 1), lambda b, t: (0, 0)),            # bn scale
                pl.BlockSpec((cout, 1), lambda b, t: (0, 0)),            # bn bias
                pl.BlockSpec((cvk, cout), lambda b, t: (0, 0)),          # [wv; wk_pad] (bf16)
                pl.BlockSpec((cvk, 1), lambda b, t: (0, 0)),             # [bv; bk_pad]
            ],
            out_specs=[
                pl.BlockSpec((1, cout, cqp), lambda b, t: (b, 0, 0)),    # V·Kn^T | value_sum
                pl.BlockSpec((1, cqp, 1), lambda b, t: (b, 0, 0)),       # sum_n Kn
            ],
            scratch_shapes=[
                pltpu.VMEM((cout, cqp), jnp.float32),
                pltpu.VMEM((cqp, 1), jnp.float32),
            ],
        ),
        compiler_params=pltpu.CompilerParams(
            dimension_semantics=("parallel", "arbitrary"),
            vmem_limit_bytes=_AAM_VMEM_LIMIT),
    )(fs[0], fs[1], fs[2], wc1, wc2, wc3, kp["bn_scale"], kp["bn_bias"],
      kp["wvk"], kp["bvk"])

    # ---------------- call 2: per-pixel output (fully parallel grid) -------------------
    def out_kernel(f1_ref, f2_ref, f3_ref, wc1_ref, wc2_ref, wc3_ref,
                   bns_ref, bnb_ref, wq_ref, bq_ref, mat_ref, ksum_ref,
                   gamma_ref, out_ref):
        feat = conv_bn_relu(f1_ref, f2_ref, f3_ref, wc1_ref, wc2_ref, wc3_ref,
                            bns_ref, bnb_ref)
        feat_b = feat.astype(jnp.bfloat16)

        q = _mm(wq_ref[...], feat_b, ((1,), (0,))) + bq_ref[...]        # (cqp, tn)
        qn = q * lax.rsqrt(jnp.sum(q * q, axis=0, keepdims=True) + _NORM_EPS)
        # tailor_sum = 1 / (N + Qn^T·(sum_n Kn + eps)); padded rows of qn are 0.
        denom = float(n) + jnp.sum(qn * (ksum_ref[0] + _ATTN_EPS),
                                   axis=0, keepdims=True)               # (1, tn)
        tailor = pl.reciprocal(denom, approx=True)
        row = lax.broadcasted_iota(jnp.int32, qn.shape, 0)
        qn_aug = jnp.where(row == cq, 1.0, qn)                          # ones row -> value_sum
        # matrix_sum = value_sum + (V·Kn^T)·Qn  (value_sum folded via the ones row)
        matrix_sum = _mm(mat_ref[0], qn_aug, ((1,), (0,)))              # (cout, tn)
        atten = gamma_ref[0] * (matrix_sum * tailor)
        out_ref[0] = (atten + feat).astype(out_ref.dtype)

    out = pl.pallas_call(
        out_kernel,
        out_shape=jax.ShapeDtypeStruct((bsz, cout, n), jnp.float32),
        grid_spec=pltpu.PrefetchScalarGridSpec(
            num_scalar_prefetch=0,
            grid=(bsz, nt),
            in_specs=[
                pl.BlockSpec((1, c1, tile_n), lambda b, t: (b, 0, t)),
                pl.BlockSpec((1, c2, tile_n), lambda b, t: (b, 0, t)),
                pl.BlockSpec((1, c3, tile_n), lambda b, t: (b, 0, t)),
                pl.BlockSpec((cout, c1), lambda b, t: (0, 0)),
                pl.BlockSpec((cout, c2), lambda b, t: (0, 0)),
                pl.BlockSpec((cout, c3), lambda b, t: (0, 0)),
                pl.BlockSpec((cout, 1), lambda b, t: (0, 0)),
                pl.BlockSpec((cout, 1), lambda b, t: (0, 0)),
                pl.BlockSpec((cqp, cout), lambda b, t: (0, 0)),          # wq_pad (bf16)
                pl.BlockSpec((cqp, 1), lambda b, t: (0, 0)),             # bq_pad
                pl.BlockSpec((1, cout, cqp), lambda b, t: (b, 0, 0)),    # stats: mat
                pl.BlockSpec((1, cqp, 1), lambda b, t: (b, 0, 0)),       # stats: ksum
                pl.BlockSpec(memory_space=pltpu.MemorySpace.SMEM),       # gamma (scalar)
            ],
            out_specs=pl.BlockSpec((1, cout, tile_n), lambda b, t: (b, 0, t)),
        ),
        compiler_params=pltpu.CompilerParams(
            # both axes parallel: v7x megacore keeps both TCs busy even at bsz=1
            dimension_semantics=("parallel", "parallel"),
            vmem_limit_bytes=_AAM_VMEM_LIMIT),
    )(fs[0], fs[1], fs[2], wc1, wc2, wc3, kp["bn_scale"], kp["bn_bias"],
      kp["wq"], kp["bq"], mat, ksum, kp["gamma"])
    return out.reshape(bsz, cout, h, w)


# ----------------------------------------------------------------------------------
# Physics recovery  x = K*input - B + input  ==  (K+1)*input - B
# (memory-bound elementwise: gridded + pipelined over (batch, lane-dense N tiles))
# ----------------------------------------------------------------------------------
def recover_kernel(kb_ref, inp_ref, out_ref):
    inp = inp_ref[0]                       # (3, tn)
    kmap = kb_ref[0, 0:1, :]               # (1, tn) -> broadcast over 3 channels
    bmap = kb_ref[0, 1:4, :]               # (3, tn)
    out_ref[0] = ((kmap + 1.0) * inp - bmap).astype(out_ref.dtype)


def physics_recover(kb_map, inp):
    bsz, _, h, w = kb_map.shape
    n = h * w
    tile_n, nt = _pick_tile(n, _REC_TILE_CAP)
    out = pl.pallas_call(
        recover_kernel,
        out_shape=jax.ShapeDtypeStruct((bsz, 3, n), jnp.float32),
        grid_spec=pltpu.PrefetchScalarGridSpec(
            num_scalar_prefetch=0,
            grid=(bsz, nt),
            in_specs=[
                pl.BlockSpec((1, 4, tile_n), lambda b, t: (b, 0, t)),
                pl.BlockSpec((1, 3, tile_n), lambda b, t: (b, 0, t)),
            ],
            out_specs=pl.BlockSpec((1, 3, tile_n), lambda b, t: (b, 0, t)),
        ),
        compiler_params=pltpu.CompilerParams(
            dimension_semantics=("parallel", "parallel")),
    )(kb_map.reshape(bsz, 4, n), inp.reshape(bsz, 3, n))
    return out.reshape(bsz, 3, h, w)


# ----------------------------------------------------------------------------------
# Parameter init (torch-like raw params) + packing for the kernels
# ----------------------------------------------------------------------------------
def init_aam_params(key, in_chan, out_chan, scale=8):
    ks = jax.random.split(key, 9)
    cq = out_chan // scale

    def wmat(k, o, i):
        return jax.random.normal(k, (o, i), jnp.float32) / jnp.sqrt(float(i))

    return dict(
        wc=wmat(ks[0], out_chan, in_chan),                          # 1x1 conv, bias=False
        # eval-mode BatchNorm folded to a per-channel affine (randomized to exercise it)
        bn_scale=(1.0 + 0.1 * jax.random.normal(ks[4], (out_chan,), jnp.float32))
                 / jnp.sqrt(1.0 + _BN_EPS),
        bn_bias=0.1 * jax.random.normal(ks[5], (out_chan,), jnp.float32),
        wq=wmat(ks[1], cq, out_chan),
        bq=0.1 * jax.random.normal(ks[6], (cq,), jnp.float32),
        wk=wmat(ks[2], cq, out_chan),
        bk=0.1 * jax.random.normal(ks[7], (cq,), jnp.float32),
        wv=wmat(ks[3], out_chan, out_chan),
        bv=0.1 * jax.random.normal(ks[8], (out_chan,), jnp.float32),
        # nn.Parameter(torch.zeros(1)); set nonzero so the attention branch contributes.
        gamma=jnp.full((1,), 0.5, jnp.float32),
    )


def pack_aam_params(p):
    """Pad Cq to a sublane-aligned Cqp (leaving >=1 spare row for the 'ones row' trick),
    fuse [wv; wk] into one weight, and cast MXU operands to bf16."""
    cq, cout = p["wq"].shape[0], p["wv"].shape[0]
    cqp = ((cq // 8) + 1) * 8                       # multiple of 8, strictly > cq

    def pad_rows(a):
        return jnp.zeros((cqp,) + a.shape[1:], a.dtype).at[:cq].set(a)

    wq_p = pad_rows(p["wq"])
    bq_p = pad_rows(p["bq"].reshape(cq, 1))
    wk_p = pad_rows(p["wk"])
    bk_p = pad_rows(p["bk"].reshape(cq, 1))
    return dict(
        cq=cq, cqp=cqp, cout=cout,
        wc=p["wc"].astype(jnp.bfloat16),
        bn_scale=p["bn_scale"].reshape(cout, 1),
        bn_bias=p["bn_bias"].reshape(cout, 1),
        wvk=jnp.concatenate([p["wv"], wk_p], axis=0).astype(jnp.bfloat16),
        bvk=jnp.concatenate([p["bv"].reshape(cout, 1), bk_p], axis=0),
        wq=wq_p.astype(jnp.bfloat16),
        bq=bq_p,
        gamma=p["gamma"].astype(jnp.float32),
    )


# ----------------------------------------------------------------------------------
# RSHazeNet.forward — defined pieces only
# ----------------------------------------------------------------------------------
def make_standin_features(key, bsz, h, w, dim):
    # TODO(synk): OverlapPatchEmbed / ConvBlock / Downsample / CMFI / DecoderBlock /
    # SKFusion / OverlapPatchUnembed are not defined in the reference source; the
    # encoder/decoder trunk is replaced by deterministic stand-in feature maps.
    k1, k2, k3, k4 = jax.random.split(key, 4)
    x_1s = jax.random.normal(k1, (bsz, dim, h, w), jnp.float32)
    x_2s = jax.random.normal(k2, (bsz, dim, h, w), jnp.float32)
    x_3s = jax.random.normal(k3, (bsz, dim, h, w), jnp.float32)
    kb_map = jax.random.normal(k4, (bsz, 4, h, w), jnp.float32) * 0.1   # stand-in K|B map
    return x_1s, x_2s, x_3s, kb_map


def rshazenet_forward(x, aam_params, feats):
    x_1s, x_2s, x_3s, kb_map = feats
    # segmentation branch: fusionS = AttentionAggregationModule (Pallas kernels).
    # Dropout2d(p=0.2) is identity at inference.
    x_s = attention_aggregation_module([x_3s, x_2s, x_1s], aam_params)
    # TODO(synk): output_level_1S (OverlapPatchUnembed 1x1 conv to class_num) is undefined upstream.

    # restoration branch: K, B = split(x_dec, [1,3]); x = K*input - B + input (Pallas kernel).
    # The trailing crop x[:, :, :h, :w] is an identity here.
    x_out = physics_recover(kb_map, x)
    return x_out, x_s


# ----------------------------------------------------------------------------------
# Pure-JAX f32 references for correctness checking
# ----------------------------------------------------------------------------------
def aam_reference(feats, p):
    fcat = jnp.concatenate(feats, axis=1)
    bsz, c, h, w = fcat.shape
    n = h * w
    xf = fcat.reshape(bsz, c, n)
    feat = jnp.einsum('oc,bcn->bon', p['wc'], xf, precision=_HIGH)
    feat = jnp.maximum(feat * p['bn_scale'][None, :, None] + p['bn_bias'][None, :, None], 0.0)
    q = jnp.einsum('oc,bcn->bon', p['wq'], feat, precision=_HIGH) + p['bq'][None, :, None]
    k = jnp.einsum('oc,bcn->bon', p['wk'], feat, precision=_HIGH) + p['bk'][None, :, None]
    v = jnp.einsum('oc,bcn->bon', p['wv'], feat, precision=_HIGH) + p['bv'][None, :, None]
    l2 = lambda t: t / jnp.sqrt(jnp.sum(t * t, axis=1, keepdims=True))
    qn, kn = l2(q), l2(k)
    tailor = 1.0 / (n + jnp.einsum('bcn,bc->bn', qn, jnp.sum(kn, -1) + _ATTN_EPS,
                                   precision=_HIGH))
    value_sum = jnp.sum(v, -1)[:, :, None]
    matrix = jnp.einsum('bmn,bcn->bmc', kn, v, precision=_HIGH)
    msum = value_sum + jnp.einsum('bmn,bmc->bcn', qn, matrix, precision=_HIGH)
    weight_value = msum * tailor[:, None, :]
    atten = p['gamma'][0] * weight_value
    return (atten + feat).reshape(bsz, c, h, w)


def recover_reference(kb_map, inp):
    kmap = kb_map[:, 0:1]
    bmap = kb_map[:, 1:4]
    return kmap * inp - bmap + inp


# ----------------------------------------------------------------------------------
if __name__ == "__main__":
    key = jax.random.PRNGKey(0)
    kx, kparam, kfeat = jax.random.split(key, 3)

    bsz, h, w, dim = 2, 16, 16, 32
    x = jax.random.normal(kx, (bsz, 3, h, w), jnp.float32)            # NCHW input image
    raw_params = init_aam_params(kparam, in_chan=dim * 3, out_chan=dim * 3)
    kernel_params = pack_aam_params(raw_params)
    feats = make_standin_features(kfeat, bsz, h, w, dim)

    x_out, x_s = rshazenet_forward(x, kernel_params, feats)
    jax.block_until_ready((x_out, x_s))

    # correctness vs plain-JAX f32 references
    x_1s, x_2s, x_3s, kb_map = feats
    ref_s = aam_reference([x_3s, x_2s, x_1s], raw_params)
    ref_x = recover_reference(kb_map, x)

    err_s = float(jnp.max(jnp.abs(x_s - ref_s)))
    # kernel uses bf16 inputs + bf16 MXU operands (f32 accumulation) vs an f32 HIGHEST
    # reference -> mixed atol/rtol tolerance.
    tol_s = 2e-3 + 2e-2 * float(jnp.max(jnp.abs(ref_s)))
    err_x = float(jnp.max(jnp.abs(x_out - ref_x)))
    assert err_s < tol_s, f"AAM kernel mismatch: {err_s} (tol {tol_s})"
    assert err_x < 1e-6, f"recover kernel mismatch: {err_x}"

    print("KERNEL_OK")
</pallas_src>

<mosaic_0001>
module attributes {stable_mosaic.version = 11 : i64} {
  func.func @stats_kernel(%arg0: i32, %arg1: i32, %arg2: memref<1x32x256xbf16, #tpu.memory_space<vmem>>, %arg3: memref<1x32x256xbf16, #tpu.memory_space<vmem>>, %arg4: memref<1x32x256xbf16, #tpu.memory_space<vmem>>, %arg5: memref<96x32xbf16, #tpu.memory_space<vmem>>, %arg6: memref<96x32xbf16, #tpu.memory_space<vmem>>, %arg7: memref<96x32xbf16, #tpu.memory_space<vmem>>, %arg8: memref<96x1xf32, #tpu.memory_space<vmem>>, %arg9: memref<96x1xf32, #tpu.memory_space<vmem>>, %arg10: memref<112x96xbf16, #tpu.memory_space<vmem>>, %arg11: memref<112x1xf32, #tpu.memory_space<vmem>>, %arg12: memref<1x96x16xf32, #tpu.memory_space<vmem>>, %arg13: memref<1x16x1xf32, #tpu.memory_space<vmem>>, %arg14: memref<96x16xf32, #tpu.memory_space<vmem>>, %arg15: memref<16x1xf32, #tpu.memory_space<vmem>>) attributes {dimension_semantics = [#tpu.dimension_semantics<parallel>, #tpu.dimension_semantics<arbitrary>], iteration_bounds = array<i64: 2, 1>, scalar_prefetch = 0 : i64, scratch_operands = 2 : i64, tpu.core_type = #tpu.core_type<tc>, window_params = [{transform_indices = @transform_0, window_bounds = array<i64: 1, 32, 256>}, {transform_indices = @transform_1, window_bounds = array<i64: 1, 32, 256>}, {transform_indices = @transform_2, window_bounds = array<i64: 1, 32, 256>}, {pipeline_mode = #tpu.pipeline_mode<synchronous>, transform_indices = @transform_3, window_bounds = array<i64: 96, 32>}, {pipeline_mode = #tpu.pipeline_mode<synchronous>, transform_indices = @transform_4, window_bounds = array<i64: 96, 32>}, {pipeline_mode = #tpu.pipeline_mode<synchronous>, transform_indices = @transform_5, window_bounds = array<i64: 96, 32>}, {pipeline_mode = #tpu.pipeline_mode<synchronous>, transform_indices = @transform_6, window_bounds = array<i64: 96, 1>}, {pipeline_mode = #tpu.pipeline_mode<synchronous>, transform_indices = @transform_7, window_bounds = array<i64: 96, 1>}, {pipeline_mode = #tpu.pipeline_mode<synchronous>, transform_indices = @transform_8, window_bounds = array<i64: 112, 96>}, {pipeline_mode = #tpu.pipeline_mode<synchronous>, transform_indices = @transform_9, window_bounds = array<i64: 112, 1>}, {transform_indices = @transform_10, window_bounds = array<i64: 1, 96, 16>}, {transform_indices = @transform_11, window_bounds = array<i64: 1, 16, 1>}]} {
    %c0_i32 = arith.constant 0 : i32
    %0 = arith.cmpi eq, %arg1, %c0_i32 : i32
    %1 = arith.extui %0 : i1 to i32
    %c0_i32_0 = arith.constant 0 : i32
    %2 = arith.cmpi ne, %1, %c0_i32_0 : i32
    scf.if %2 {
      %cst_53 = arith.constant 0.000000e+00 : f32
      %78 = vector.broadcast %cst_53 : f32 to vector<96x16xf32>
      %c0_54 = arith.constant 0 : index
      %c0_55 = arith.constant 0 : index
      %79 = vector.load %arg14[%c0_54, %c0_55] : memref<96x16xf32, #tpu.memory_space<vmem>>, vector<96x16xf32>
      tpu.vector_store %arg14[%c0_54, %c0_55], %78 {strides = array<i32>} : memref<96x16xf32, #tpu.memory_space<vmem>>, vector<96x16xf32>,
      %cst_56 = arith.constant 0.000000e+00 : f32
      %80 = vector.broadcast %cst_56 : f32 to vector<16x1xf32>
      %c0_57 = arith.constant 0 : index
      %c0_58 = arith.constant 0 : index
      %81 = vector.load %arg15[%c0_57, %c0_58] : memref<16x1xf32, #tpu.memory_space<vmem>>, vector<16x1xf32>
      tpu.vector_store %arg15[%c0_57, %c0_58], %80 {strides = array<i32>} : memref<16x1xf32, #tpu.memory_space<vmem>>, vector<16x1xf32>,
    } else {
    }
    %c0 = arith.constant 0 : index
    %c0_1 = arith.constant 0 : index
    %3 = vector.load %arg5[%c0, %c0_1] : memref<96x32xbf16, #tpu.memory_space<vmem>>, vector<96x32xbf16>
    %c0_2 = arith.constant 0 : index
    %c0_3 = arith.constant 0 : index
    %c0_4 = arith.constant 0 : index
    %4 = vector.load %arg2[%c0_2, %c0_3, %c0_4] : memref<1x32x256xbf16, #tpu.memory_space<vmem>>, vector<1x32x256xbf16>
    %5 = vector.shape_cast %4 : vector<1x32x256xbf16> to vector<32x256xbf16>
    %cst = arith.constant dense<0.000000e+00> : vector<96x256xf32>
    %6 = tpu.matmul %3, %5, %cst {dimension_numbers = #tpu.dot_dimension_numbers<[1], [0], [0], [1], [0, 0, 1, 1], [], []>} : vector<96x32xbf16>, vector<32x256xbf16>, vector<96x256xf32> -> vector<96x256xf32>
    %c0_5 = arith.constant 0 : index
    %c0_6 = arith.constant 0 : index
    %7 = vector.load %arg6[%c0_5, %c0_6] : memref<96x32xbf16, #tpu.memory_space<vmem>>, vector<96x32xbf16>
    %c0_7 = arith.constant 0 : index
    %c0_8 = arith.constant 0 : index
    %c0_9 = arith.constant 0 : index
    %8 = vector.load %arg3[%c0_7, %c0_8, %c0_9] : memref<1x32x256xbf16, #tpu.memory_space<vmem>>, vector<1x32x256xbf16>
    %9 = vector.shape_cast %8 : vector<1x32x256xbf16> to vector<32x256xbf16>
    %cst_10 = arith.constant dense<0.000000e+00> : vector<96x256xf32>
    %10 = tpu.matmul %7, %9, %cst_10 {dimension_numbers = #tpu.dot_dimension_numbers<[1], [0], [0], [1], [0, 0, 1, 1], [], []>} : vector<96x32xbf16>, vector<32x256xbf16>, vector<96x256xf32> -> vector<96x256xf32>
    %11 = arith.addf %6, %10 : vector<96x256xf32>
    %c0_11 = arith.constant 0 : index
    %c0_12 = arith.constant 0 : index
    %12 = vector.load %arg7[%c0_11, %c0_12] : memref<96x32xbf16, #tpu.memory_space<vmem>>, vector<96x32xbf16>
    %c0_13 = arith.constant 0 : index
    %c0_14 = arith.constant 0 : index
    %c0_15 = arith.constant 0 : index
    %13 = vector.load %arg4[%c0_13, %c0_14, %c0_15] : memref<1x32x256xbf16, #tpu.memory_space<vmem>>, vector<1x32x256xbf16>
    %14 = vector.shape_cast %13 : vector<1x32x256xbf16> to vector<32x256xbf16>
    %cst_16 = arith.constant dense<0.000000e+00> : vector<96x256xf32>
    %15 = tpu.matmul %12, %14, %cst_16 {dimension_numbers = #tpu.dot_dimension_numbers<[1], [0], [0], [1], [0, 0, 1, 1], [], []>} : vector<96x32xbf16>, vector<32x256xbf16>, vector<96x256xf32> -> vector<96x256xf32>
    %16 = arith.addf %11, %15 : vector<96x256xf32>
    %c0_17 = arith.constant 0 : index
    %c0_18 = arith.constant 0 : index
    %17 = vector.load %arg8[%c0_17, %c0_18] : memref<96x1xf32, #tpu.memory_space<vmem>>, vector<96x1xf32>
    %18 = vector.broadcast %17 : vector<96x1xf32> to vector<96x256xf32>
    %19 = arith.mulf %16, %18 : vector<96x256xf32>
    %c0_19 = arith.constant 0 : index
    %c0_20 = arith.constant 0 : index
    %20 = vector.load %arg9[%c0_19, %c0_20] : memref<96x1xf32, #tpu.memory_space<vmem>>, vector<96x1xf32>
    %21 = vector.broadcast %20 : vector<96x1xf32> to vector<96x256xf32>
    %22 = arith.addf %19, %21 : vector<96x256xf32>
    %cst_21 = arith.constant 0.000000e+00 : f32
    %23 = vector.broadcast %cst_21 : f32 to vector<96x256xf32>
    %24 = arith.maximumf %22, %23 : vector<96x256xf32>
    %25 = tpu.iota {dimensions = array<i32: 1>} : vector<1x256xi32>
    %c256_i32 = arith.constant 256 : i32
    %26 = arith.muli %arg1, %c256_i32 : i32
    %c256_i32_22 = arith.constant 256 : i32
    %27 = arith.subi %c256_i32_22, %26 : i32
    %28 = vector.broadcast %27 : i32 to vector<1x256xi32>
    %29 = arith.cmpi slt, %25, %28 : vector<1x256xi32>
    %cst_23 = arith.constant 0.000000e+00 : f32
    %30 = vector.shape_cast %29 : vector<1x256xi1> to vector<1x256xi1>
    %31 = vector.broadcast %30 : vector<1x256xi1> to vector<96x256xi1>
    %32 = vector.broadcast %cst_23 : f32 to vector<96x256xf32>
    %33 = arith.select %31, %24, %32 : vector<96x256xi1>, vector<96x256xf32>
    %34 = arith.truncf %33 : vector<96x256xf32> to vector<96x256xbf16>
    %c0_24 = arith.constant 0 : index
    %c0_25 = arith.constant 0 : index
    %35 = vector.load %arg10[%c0_24, %c0_25] : memref<112x96xbf16, #tpu.memory_space<vmem>>, vector<112x96xbf16>
    %cst_26 = arith.constant dense<0.000000e+00> : vector<112x256xf32>
    %36 = tpu.matmul %35, %34, %cst_26 {dimension_numbers = #tpu.dot_dimension_numbers<[1], [0], [0], [1], [0, 0, 1, 1], [], []>} : vector<112x96xbf16>, vector<96x256xbf16>, vector<112x256xf32> -> vector<112x256xf32>
    %c0_27 = arith.constant 0 : index
    %c0_28 = arith.constant 0 : index
    %37 = vector.load %arg11[%c0_27, %c0_28] : memref<112x1xf32, #tpu.memory_space<vmem>>, vector<112x1xf32>
    %38 = vector.broadcast %37 : vector<112x1xf32> to vector<112x256xf32>
    %39 = arith.addf %36, %38 : vector<112x256xf32>
    %40 = vector.extract_strided_slice %39 {offsets = [0, 0], sizes = [96, 256], strides = [1, 1]} : vector<112x256xf32> to vector<96x256xf32>
    %41 = vector.extract_strided_slice %39 {offsets = [96, 0], sizes = [16, 256], strides = [1, 1]} : vector<112x256xf32> to vector<16x256xf32>
    %42 = arith.mulf %41, %41 : vector<16x256xf32>
    %cst_29 = arith.constant dense<0.000000e+00> : vector<256xf32>
    %43 = vector.multi_reduction <add>, %42, %cst_29 [0] : vector<16x256xf32> to vector<256xf32>
    %44 = vector.shape_cast %43 : vector<256xf32> to vector<1x256xf32>
    %cst_30 = arith.constant 9.99999996E-13 : f32
    %45 = vector.broadcast %cst_30 : f32 to vector<1x256xf32>
    %46 = arith.addf %44, %45 : vector<1x256xf32>
    %47 = math.rsqrt %46 : vector<1x256xf32>
    %48 = vector.broadcast %47 : vector<1x256xf32> to vector<16x256xf32>
    %49 = arith.mulf %41, %48 : vector<16x256xf32>
    %50 = tpu.iota {dimensions = array<i32: 0>} : vector<16x256xi32>
    %c12_i32 = arith.constant 12 : i32
    %51 = vector.broadcast %c12_i32 : i32 to vector<16x256xi32>
    %52 = arith.cmpi eq, %50, %51 : vector<16x256xi32>
    %cst_31 = arith.constant 1.000000e+00 : f32
    %53 = vector.broadcast %cst_31 : f32 to vector<16x256xf32>
    %54 = arith.select %52, %53, %49 : vector<16x256xi1>, vector<16x256xf32>
    %cst_32 = arith.constant 0.000000e+00 : f32
    %55 = vector.shape_cast %29 : vector<1x256xi1> to vector<1x256xi1>
    %56 = vector.broadcast %55 : vector<1x256xi1> to vector<16x256xi1>
    %57 = vector.broadcast %cst_32 : f32 to vector<16x256xf32>
    %58 = arith.select %56, %54, %57 : vector<16x256xi1>, vector<16x256xf32>
    %c0_33 = arith.constant 0 : index
    %c0_34 = arith.constant 0 : index
    %59 = vector.load %arg15[%c0_33, %c0_34] : memref<16x1xf32, #tpu.memory_space<vmem>>, vector<16x1xf32>
    %cst_35 = arith.constant dense<0.000000e+00> : vector<16xf32>
    %60 = vector.multi_reduction <add>, %58, %cst_35 [1] : vector<16x256xf32> to vector<16xf32>
    %61 = vector.shape_cast %60 : vector<16xf32> to vector<16x1xf32>
    %62 = arith.addf %59, %61 : vector<16x1xf32>
    %c0_36 = arith.constant 0 : index
    %c0_37 = arith.constant 0 : index
    %63 = vector.load %arg15[%c0_36, %c0_37] : memref<16x1xf32, #tpu.memory_space<vmem>>, vector<16x1xf32>
    tpu.vector_store %arg15[%c0_36, %c0_37], %62 {strides = array<i32>} : memref<16x1xf32, #tpu.memory_space<vmem>>, vector<16x1xf32>,
    %c0_38 = arith.constant 0 : index
    %c0_39 = arith.constant 0 : index
    %64 = vector.load %arg14[%c0_38, %c0_39] : memref<96x16xf32, #tpu.memory_space<vmem>>, vector<96x16xf32>
    %65 = arith.truncf %40 : vector<96x256xf32> to vector<96x256xbf16>
    %66 = arith.truncf %58 : vector<16x256xf32> to vector<16x256xbf16>
    %cst_40 = arith.constant dense<0.000000e+00> : vector<96x16xf32>
    %67 = tpu.matmul %65, %66, %cst_40 {dimension_numbers = #tpu.dot_dimension_numbers<[1], [1], [0], [0], [0, 0, 1, 0], [], []>} : vector<96x256xbf16>, vector<16x256xbf16>, vector<96x16xf32> -> vector<96x16xf32>
    %68 = arith.addf %64, %67 : vector<96x16xf32>
    %c0_41 = arith.constant 0 : index
    %c0_42 = arith.constant 0 : index
    %69 = vector.load %arg14[%c0_41, %c0_42] : memref<96x16xf32, #tpu.memory_space<vmem>>, vector<96x16xf32>
    tpu.vector_store %arg14[%c0_41, %c0_42], %68 {strides = array<i32>} : memref<96x16xf32, #tpu.memory_space<vmem>>, vector<96x16xf32>,
    %c0_43 = arith.constant 0 : index
    %c0_44 = arith.constant 0 : index
    %70 = vector.load %arg14[%c0_43, %c0_44] : memref<96x16xf32, #tpu.memory_space<vmem>>, vector<96x16xf32>
    %c0_45 = arith.constant 0 : index
    %c0_46 = arith.constant 0 : index
    %c0_47 = arith.constant 0 : index
    %71 = vector.load %arg12[%c0_45, %c0_46, %c0_47] : memref<1x96x16xf32, #tpu.memory_space<vmem>>, vector<1x96x16xf32>
    %72 = vector.shape_cast %71 : vector<1x96x16xf32> to vector<96x16xf32>
    %73 = vector.shape_cast %70 : vector<96x16xf32> to vector<1x96x16xf32>
    tpu.vector_store %arg12[%c0_45, %c0_46, %c0_47], %73 {strides = array<i32>} : memref<1x96x16xf32, #tpu.memory_space<vmem>>, vector<1x96x16xf32>,
    %c0_48 = arith.constant 0 : index
    %c0_49 = arith.constant 0 : index
    %74 = vector.load %arg15[%c0_48, %c0_49] : memref<16x1xf32, #tpu.memory_space<vmem>>, vector<16x1xf32>
    %c0_50 = arith.constant 0 : index
    %c0_51 = arith.constant 0 : index
    %c0_52 = arith.constant 0 : index
    %75 = vector.load %arg13[%c0_50, %c0_51, %c0_52] : memref<1x16x1xf32, #tpu.memory_space<vmem>>, vector<1x16x1xf32>
    %76 = vector.shape_cast %75 : vector<1x16x1xf32> to vector<16x1xf32>
    %77 = vector.shape_cast %74 : vector<16x1xf32> to vector<1x16x1xf32>
    tpu.vector_store %arg13[%c0_50, %c0_51, %c0_52], %77 {strides = array<i32>} : memref<1x16x1xf32, #tpu.memory_space<vmem>>, vector<1x16x1xf32>,
    return
  }
  func.func @transform_0(%arg0: i32, %arg1: i32) -> (i32, i32, i32) {
    %c0_i32 = arith.constant 0 : i32
    %c0_i32_0 = arith.constant 0 : i32
    return %arg0, %c0_i32, %arg1 : i32, i32, i32
  }
  func.func @transform_1(%arg0: i32, %arg1: i32) -> (i32, i32, i32) {
    %c0_i32 = arith.constant 0 : i32
    %c0_i32_0 = arith.constant 0 : i32
    return %arg0, %c0_i32, %arg1 : i32, i32, i32
  }
  func.func @transform_2(%arg0: i32, %arg1: i32) -> (i32, i32, i32) {
    %c0_i32 = arith.constant 0 : i32
    %c0_i32_0 = arith.constant 0 : i32
    return %arg0, %c0_i32, %arg1 : i32, i32, i32
  }
  func.func @transform_3(%arg0: i32, %arg1: i32) -> (i32, i32) {
    %c0_i32 = arith.constant 0 : i32
    %c0_i32_0 = arith.constant 0 : i32
    %c0_i32_1 = arith.constant 0 : i32
    return %c0_i32, %c0_i32_0 : i32, i32
  }
  func.func @transform_4(%arg0: i32, %arg1: i32) -> (i32, i32) {
    %c0_i32 = arith.constant 0 : i32
    %c0_i32_0 = arith.constant 0 : i32
    %c0_i32_1 = arith.constant 0 : i32
    return %c0_i32, %c0_i32_0 : i32, i32
  }
  func.func @transform_5(%arg0: i32, %arg1: i32) -> (i32, i32) {
    %c0_i32 = arith.constant 0 : i32
    %c0_i32_0 = arith.constant 0 : i32
    %c0_i32_1 = arith.constant 0 : i32
    return %c0_i32, %c0_i32_0 : i32, i32
  }
  func.func @transform_6(%arg0: i32, %arg1: i32) -> (i32, i32) {
    %c0_i32 = arith.constant 0 : i32
    %c0_i32_0 = arith.constant 0 : i32
    %c0_i32_1 = arith.constant 0 : i32
    return %c0_i32, %c0_i32_0 : i32, i32
  }
  func.func @transform_7(%arg0: i32, %arg1: i32) -> (i32, i32) {
    %c0_i32 = arith.constant 0 : i32
    %c0_i32_0 = arith.constant 0 : i32
    %c0_i32_1 = arith.constant 0 : i32
    return %c0_i32, %c0_i32_0 : i32, i32
  }
  func.func @transform_8(%arg0: i32, %arg1: i32) -> (i32, i32) {
    %c0_i32 = arith.constant 0 : i32
    %c0_i32_0 = arith.constant 0 : i32
    %c0_i32_1 = arith.constant 0 : i32
    return %c0_i32, %c0_i32_0 : i32, i32
  }
  func.func @transform_9(%arg0: i32, %arg1: i32) -> (i32, i32) {
    %c0_i32 = arith.constant 0 : i32
    %c0_i32_0 = arith.constant 0 : i32
    %c0_i32_1 = arith.constant 0 : i32
    return %c0_i32, %c0_i32_0 : i32, i32
  }
  func.func @transform_10(%arg0: i32, %arg1: i32) -> (i32, i32, i32) {
    %c0_i32 = arith.constant 0 : i32
    %c0_i32_0 = arith.constant 0 : i32
    %c0_i32_1 = arith.constant 0 : i32
    return %arg0, %c0_i32, %c0_i32_0 : i32, i32, i32
  }
  func.func @transform_11(%arg0: i32, %arg1: i32) -> (i32, i32, i32) {
    %c0_i32 = arith.constant 0 : i32
    %c0_i32_0 = arith.constant 0 : i32
    %c0_i32_1 = arith.constant 0 : i32
    return %arg0, %c0_i32, %c0_i32_0 : i32, i32, i32
  }
}

</mosaic_0001>

<bundles_post_ra>
// kernel: tpu_custom_call.1
= control target key start
LH: loop header
LB: loop body
LE: loop exit
PB: predicated region body
PF: predicated region fallthrough
CT: control target
= control target key end

     0   :  { %s2241_s17 = smov 0   ;;  %s2243_s18 = smov 0   ;;  %s2712_s0 = inlined_call_operand.vmem [shape: bf16[2,32,256], index: 0, kind: input, shape index: {}]   ;;  %s2713_s1 = inlined_call_operand.vmem [shape: bf16[2,32,256], index: 1, kind: input, shape index: {}]   ;;  %s2714_s2 = inlined_call_operand.vmem [shape: bf16[2,32,256], index: 2, kind: input, shape index: {}]   ;;  %s2715_s3 = inlined_call_operand.vmem [shape: bf16[96,32], index: 3, kind: input, shape index: {}]   ;;  %s2716_s4 = inlined_call_operand.vmem [shape: bf16[96,32], index: 4, kind: input, shape index: {}]   ;;  %s2717_s5 = inlined_call_operand.vmem [shape: bf16[96,32], index: 5, kind: input, shape index: {}]   ;;  %s2718_s6 = inlined_call_operand.vmem [shape: f32[96,1], index: 6, kind: input, shape index: {}]   ;;  %s2719_s7 = inlined_call_operand.vmem [shape: f32[96,1], index: 7, kind: input, shape index: {}]   ;;  %s2720_s8 = inlined_call_operand.vmem [shape: bf16[112,96], index: 8, kind: input, shape index: {}]   ;;  %s2721_s9 = inlined_call_operand.vmem [shape: f32[112,1], index: 9, kind: input, shape index: {}]   ;;  %s2722_s10 = inlined_call_operand.vmem [shape: f32[2,96,16], index: 10, kind: output, shape index: {0}]   ;;  %s2723_s11 = inlined_call_operand.vmem [shape: f32[2,16,1], index: 11, kind: output, shape index: {1}]  }
   0x1   :  { %s2245_s19 = smov 0  }
   0x2 LB: > { %s34_s20 = sadd.s32 1, %s2173_s18  ;;  %p1953_p0 = scmp.ge.s32.totalorder %s2177_s19, 1  ;;  %s2177_s19 = sphi %s2245_s19, %s22_s19   ;;  %s2173_s18 = sphi %s2243_s18, %s2725_s18   ;;  %s2169_s17 = sphi %s2241_s17, %s2724_s17  }
   0x3   : > { %p36_p1 = scmp.ge.s32.totalorder %s34_s20, 2  ;;  %p393_p2 = scmp.lt.s32.totalorder %s2177_s19, 3 }
   0x5   : > { %s2727_s20 = smov (%p36_p1, %s34_s20), 0  ;;  %p394_p3 = pnand %p1953_p0, %p393_p2 }
   0x6   : > { %p461_p4 = scmp.lt.s32.totalorder (!%p394_p3), %s2169_s17, 1  ;;  %v2179_v0 = vmov (!%p394_p3), 0   ;;  %v2114_v6 = vld [vmem:[%s2716_s4] sm:$0xff] (!%p394_p3)   ;;  %vm603_vm0 = vcmask (!%p394_p3), 261120   ;;  %v2115_v11 = vld [vmem:[%s2716_s4 + $0x8] sm:$0xff] (!%p394_p3)   ;;  %v2116_v16 = vld [vmem:[%s2716_s4 + $0x10] sm:$0xff] (!%p394_p3)  }
   0x7   : > { %397 = sbr.rel (%p394_p3) target bundleno = 961 (0x3c1), region = 60  ;;  %654 = vmatprep.mubr.bf16.mxu0 (!%p394_p3), %v2179_v0  ;;  %2107 = vset.pattern.permute.xlu1 (!%p394_p3), %v2179_v0  ;;  %v1173_v12 = vld [vmem:[%s2719_s7] sm:$0xff] (!%p394_p3)  ;;  %v1174_v14 = vld [vmem:[%s2719_s7 + $0x8] sm:$0xff] (!%p394_p3)  ;;  %v1080_v17 = vld [vmem:[%s2718_s6 + $0x18] sm:$0xff] (!%p394_p3)  ;;  %vm1474_vm1 = vcmask (!%p394_p3), 785408   ;;  %vm518_vm2 = vcmask (!%p394_p3), 7168  }
   0x8   : > { %2106 = vset.pattern.permute.xlu0 (!%p394_p3), %v2179_v0  ;;  %1528 = vmatprep.mubr.bf16.mxu1 (!%p394_p3), %v2179_v0  ;;  %v1077_v13 = vld [vmem:[%s2718_s6] sm:$0xff] (!%p394_p3)  ;;  %v1078_v15 = vld [vmem:[%s2718_s6 + $0x8] sm:$0xff] (!%p394_p3)  ;;  %v1079_v18 = vld [vmem:[%s2718_s6 + $0x10] sm:$0xff] (!%p394_p3)  ;;  %vm505_vm4 = vcmask (!%p394_p3), 130048  }
   0x9   : > { %1187 = vperm.xlu1 (!%p394_p3), %2107, %v1173_v12   ;;  %1091 = vperm.xlu0 (!%p394_p3), %2106, %v1077_v13   ;;  %v1176_v19 = vld [vmem:[%s2719_s7 + $0x18] sm:$0xff] (!%p394_p3)  ;;  %v1175_v20 = vld [vmem:[%s2719_s7 + $0x10] sm:$0xff] (!%p394_p3)  ;;  %v1082_v22 = vld [vmem:[%s2718_s6 + $0x28] sm:$0xff] (!%p394_p3) }
   0xa   : > { %v2117_v21 = vld [vmem:[%s2716_s4 + $0x18] sm:$0xff] (!%p394_p3)   ;;  %v1081_v23 = vld [vmem:[%s2718_s6 + $0x20] sm:$0xff] (!%p394_p3)  ;;  %v1178_v24 = vld [vmem:[%s2719_s7 + $0x28] sm:$0xff] (!%p394_p3) }
   0xb   : > { %v1177_v25 = vld [vmem:[%s2719_s7 + $0x20] sm:$0xff] (!%p394_p3)  ;;  %v1084_v27 = vld [vmem:[%s2718_s6 + $0x38] sm:$0xff] (!%p394_p3)  ;;  %v1083_v28 = vld [vmem:[%s2718_s6 + $0x30] sm:$0xff] (!%p394_p3) }
   0xc   : > { %v2118_v26 = vld [vmem:[%s2716_s4 + $0x20] sm:$0xff] (!%p394_p3)   ;;  %v1180_v29 = vld [vmem:[%s2719_s7 + $0x38] sm:$0xff] (!%p394_p3)  ;;  %v1179_v30 = vld [vmem:[%s2719_s7 + $0x30] sm:$0xff] (!%p394_p3) }
   0xd   : > { %1192 = vperm.xlu1 (!%p394_p3), %2107, %v1174_v14   ;;  %1096 = vperm.xlu0 (!%p394_p3), %2106, %v1078_v15   ;;  %v2119_v31 = vld [vmem:[%s2716_s4 + $0x28] sm:$0xff] (!%p394_p3)   ;;  %v1085_v33 = vld [vmem:[%s2718_s6 + $0x40] sm:$0xff] (!%p394_p3)  ;;  %v1088_v37 = vld [vmem:[%s2718_s6 + $0x58] sm:$0xff] (!%p394_p3) }
   0xe   : > { %s2729_s17 = smov (!%p461_p4, %s2169_s17), 1  ;;  %v1086_v32 = vld [vmem:[%s2718_s6 + $0x48] sm:$0xff]  ;;  %v1181_v35 = vld [vmem:[%s2719_s7 + $0x40] sm:$0xff]  ;;  %v1087_v38 = vld [vmem:[%s2718_s6 + $0x50] sm:$0xff] }
   0xf   : > { %s2027_s21 = sshll.u32 %s2729_s17, 5  ;;  %v1182_v34 = vld [vmem:[%s2719_s7 + $0x48] sm:$0xff]  ;;  %v2126_v36 = vld [vmem:[%s2715_s3] sm:$0xff]   ;;  %v1184_v41 = vld [vmem:[%s2719_s7 + $0x58] sm:$0xff]  ;;  %s2030_s26 = sshll.u32 %s2729_s17, 4 }
  0x10   : > { %s478_s24 = scalar_lea.vmem %s2713_s1, %s2027_s21  ;;  %s468_s27 = scalar_lea.vmem %s2712_s0, %s2027_s21  ;;  %v1183_v42 = vld [vmem:[%s2719_s7 + $0x50] sm:$0xff]  ;;  %v2127_v44 = vld [vmem:[%s2715_s3 + $0x8] sm:$0xff]   ;;  %v1367_v46 = vld [vmem:[%s2721_s9 + $0x60] sm:$0xff] }
  0x11   : > { %v2108_v1 = vld [vmem:[%s478_s24 + $0x4] ss:$8 sps:$4 sm:$0xff]   ;;  %v2110_v2 = vld [vmem:[%s478_s24] ss:$8 sps:$4 sm:$0xff]   ;;  %v2111_v3 = vld [vmem:[%s478_s24 + $0x14] ss:$8 sps:$4 sm:$0xff]   ;;  %s2278_s13 = scalar_lea.vmem %s2714_s2, %s2027_s21  ;;  %1106 = vperm.xlu1 %2107, %v1080_v17   ;;  %1101 = vperm.xlu0 %2106, %v1079_v18   ;;  %s499_s28 = scalar_lea.vmem %s2723_s11, %s2030_s26 }
  0x12   : > { %622 = vmatprep.subr.bf16.mxu0 %v2108_v1  ;;  %v2113_v4 = vld [vmem:[%s478_s24 + $0x10] ss:$8 sps:$4 sm:$0xff]   ;;  %v2122_v5 = vld [vmem:[%s468_s27 + $0x4] ss:$8 sps:$4 sm:$0xff]   ;;  %v2120_v7 = vld [vmem:[%s468_s27] ss:$8 sps:$4 sm:$0xff]  }
  0x13   : > { %623 = vmatpush1.bf16.msra.mxu0 %v2110_v2  ;;  %v2125_v8 = vld [vmem:[%s468_s27 + $0x14] ss:$8 sps:$4 sm:$0xff]   ;;  %v2123_v9 = vld [vmem:[%s468_s27 + $0x10] ss:$8 sps:$4 sm:$0xff]   ;;  %v2134_v10 = vld [vmem:[%s2278_s13 + $0x4] ss:$8 sps:$4 sm:$0xff]  }
  0x14   : > { %624 = vmatprep.subr.bf16.mxu0 %v2111_v3  ;;  %v2132_v39 = vld [vmem:[%s2278_s13] ss:$8 sps:$4 sm:$0xff]   ;;  %v2137_v40 = vld [vmem:[%s2278_s13 + $0x14] ss:$8 sps:$4 sm:$0xff]   ;;  %v2135_v43 = vld [vmem:[%s2278_s13 + $0x10] ss:$8 sps:$4 sm:$0xff]  }
  0x15   : > { %1202 = vperm.xlu1 %2107, %v1176_v19   ;;  %1197 = vperm.xlu0 %2106, %v1175_v20   ;;  %v1368_v45 = vld [vmem:[%s2721_s9 + $0x68] sm:$0xff]  ;;  %v1355_v48 = vld [vmem:[%s2721_s9] sm:$0xff]  ;;  %v2128_v49 = vld [vmem:[%s2715_s3 + $0x10] sm:$0xff]   ;;  %s2079_s29 = smul.u32 96, %s2729_s17 }
  0x16   : > { %v1356_v47 = vld [vmem:[%s2721_s9 + $0x8] sm:$0xff]  ;;  %v1358_v50 = vld [vmem:[%s2721_s9 + $0x18] sm:$0xff]  ;;  %v1357_v51 = vld [vmem:[%s2721_s9 + $0x10] sm:$0xff] }
  0x17   : > { %625 = vmatpush1.bf16.msra.mxu0 %v2113_v4  ;;  %v1360_v52 = vld [vmem:[%s2721_s9 + $0x28] sm:$0xff]  ;;  %v1359_v53 = vld [vmem:[%s2721_s9 + $0x20] sm:$0xff]  ;;  %v2129_v54 = vld [vmem:[%s2715_s3 + $0x18] sm:$0xff]   ;;  %s2667_s14 = scalar_lea.vmem %s2722_s10, %s2079_s29 }
  0x18   : > { %783 = vmatprep.subr.bf16.mxu0 %v2122_v5  ;;  %v1362_v55 = vld [vmem:[%s2721_s9 + $0x38] sm:$0xff]  ;;  %v1361_v56 = vld [vmem:[%s2721_s9 + $0x30] sm:$0xff]  ;;  %v1364_v57 = vld [vmem:[%s2721_s9 + $0x48] sm:$0xff] }
  0x19   : > { %1116 = vperm.xlu1 %2107, %v1082_v22   ;;  %1111 = vperm.xlu0 %2106, %v1081_v23   ;;  %v1363_v58 = vld [vmem:[%s2721_s9 + $0x40] sm:$0xff]  ;;  %v1366_v60 = vld [vmem:[%s2721_s9 + $0x58] sm:$0xff]  ;;  %v1365_v61 = vld [vmem:[%s2721_s9 + $0x50] sm:$0xff] }
  0x1a   : > { %1973 = vmatmul.mubr.msk.bf16.vlgmr.msra.gmra.mrb[0].mxu0 %vm603_vm0, %v2114_v6  ;;  %v2130_v59 = vld [vmem:[%s2715_s3 + $0x20] sm:$0xff]   ;;  %v2131_v62 = vld [vmem:[%s2715_s3 + $0x28] sm:$0xff]   ;;  %v2140_v2 = vld [vmem:[%s2717_s5 + $0x10] sm:$0xff]  }
  0x1b   : > { %664 = vmatprep.mubr.bf16.mxu0 %v2179_v0  ;;  %784 = vmatpush1.bf16.msra.mxu0 %v2120_v7  ;;  %v2138_v63 = vld [vmem:[%s2717_s5] sm:$0xff]   ;;  %v2139_v1 = vld [vmem:[%s2717_s5 + $0x8] sm:$0xff]   ;;  %v2141_v3 = vld [vmem:[%s2717_s5 + $0x18] sm:$0xff]  }
  0x1c   : > { %785 = vmatprep.subr.bf16.mxu0 %v2125_v8  ;;  %v2142_v4 = vld [vmem:[%s2717_s5 + $0x20] sm:$0xff]   ;;  %v2143_v5 = vld [vmem:[%s2717_s5 + $0x28] sm:$0xff]  }
  0x1d   : > { %1212 = vperm.xlu1 %2107, %v1178_v24   ;;  %1207 = vperm.xlu0 %2106, %v1177_v25  }
  0x1f   : > { %786 = vmatpush1.bf16.msra.mxu0 %v2123_v9 }
  0x20   : > { %960 = vmatprep.subr.bf16.mxu0 %v2134_v10 }
  0x21   : > { %1126 = vperm.xlu1 %2107, %v1084_v27   ;;  %1121 = vperm.xlu0 %2106, %v1083_v28  }
  0x22   : > { %1974 = vmatmul.mubr.msk.bf16.gmra.mrb[4].mxu0 %vm603_vm0, %v2115_v11 }
  0x23   : > { %674 = vmatprep.mubr.bf16.mxu0 %v2179_v0 }
  0x25   : > { %1222 = vperm.xlu1 %2107, %v1180_v29   ;;  %1217 = vperm.xlu0 %2106, %v1179_v30  }
  0x29   : > { %1136 = vperm.xlu1 %2107, %v1086_v32   ;;  %1131 = vperm.xlu0 %2106, %v1085_v33  }
  0x2a   : > { %1975 = vmatmul.mubr.msk.bf16.gmra.mrb[8].mxu0 %vm603_vm0, %v2116_v16 }
  0x2b   : > { %684 = vmatprep.mubr.bf16.mxu0 %v2179_v0 }
  0x2d   : > { %1232 = vperm.xlu1 %2107, %v1182_v34   ;;  %1227 = vperm.xlu0 %2106, %v1181_v35  }
  0x31   : > { %1146 = vperm.xlu1 %2107, %v1088_v37   ;;  %1141 = vperm.xlu0 %2106, %v1087_v38  }
  0x32   : > { %1976 = vmatmul.mubr.msk.bf16.gmra.mrb[12].mxu0 %vm603_vm0, %v2117_v21 }
  0x33   : > { %694 = vmatprep.mubr.bf16.mxu0 %v2179_v0 }
  0x35   : > { %1242 = vperm.xlu1 %2107, %v1184_v41   ;;  %1237 = vperm.xlu0 %2106, %v1183_v42  }
  0x39   : > { %1436 = vperm.xlu1 %2107, %v1368_v45   ;;  %1431 = vperm.xlu0 %2106, %v1367_v46  }
  0x3a   : > { %1977 = vmatmul.mubr.msk.bf16.gmra.mrb[16].mxu0 %vm603_vm0, %v2118_v26 }
  0x3b   : > { %704 = vmatprep.mubr.bf16.mxu0 %v2179_v0 }
  0x3d   : > { %1376 = vperm.xlu1 %2107, %v1356_v47   ;;  %1371 = vperm.xlu0 %2106, %v1355_v48  }
  0x41   : > { %1386 = vperm.xlu1 %2107, %v1358_v50   ;;  %1381 = vperm.xlu0 %2106, %v1357_v51  }
  0x42   : > { %1978 = vmatmul.mubr.msk.bf16.gmra.mrb[20].mxu0 %vm603_vm0, %v2119_v31 }
  0x43   : > { %815 = vmatprep.mubr.bf16.mxu0 %v2179_v0 }
  0x45   : > { %1396 = vperm.xlu1 %2107, %v1360_v52   ;;  %1391 = vperm.xlu0 %2106, %v1359_v53  }
  0x49   : > { %1406 = vperm.xlu1 %2107, %v1362_v55   ;;  %1401 = vperm.xlu0 %2106, %v1361_v56  }
  0x4a   : > { %1989 = vmatmul.mubr.msk.bf16.vlgmr.msra.gmra.mrb[0].mxu0 %vm603_vm0, %v2126_v36 }
  0x4b   : > { %825 = vmatprep.mubr.bf16.mxu0 %v2179_v0  ;;  %961 = vmatpush1.bf16.msra.mxu0 %v2132_v39 }
  0x4c   : > { %962 = vmatprep.subr.bf16.mxu0 %v2137_v40 }
  0x4d   : > { %1416 = vperm.xlu1 %2107, %v1364_v57   ;;  %1411 = vperm.xlu0 %2106, %v1363_v58  }
  0x4f   : > { %963 = vmatpush1.bf16.msra.mxu0 %v2135_v43 }
  0x51   : > { %1426 = vperm.xlu1 %2107, %v1366_v60   ;;  %1421 = vperm.xlu0 %2106, %v1365_v61  }
  0x52   : > { %1990 = vmatmul.mubr.msk.bf16.gmra.mrb[4].mxu0 %vm603_vm0, %v2127_v44 }
  0x53   : > { %835 = vmatprep.mubr.bf16.mxu0 %v2179_v0 }
  0x5a   : > { %1991 = vmatmul.mubr.msk.bf16.gmra.mrb[8].mxu0 %vm603_vm0, %v2128_v49 }
  0x5b   : > { %845 = vmatprep.mubr.bf16.mxu0 %v2179_v0 }
  0x62   : > { %1992 = vmatmul.mubr.msk.bf16.gmra.mrb[12].mxu0 %vm603_vm0, %v2129_v54 }
  0x63   : > { %855 = vmatprep.mubr.bf16.mxu0 %v2179_v0 }
  0x6a   : > { %1993 = vmatmul.mubr.msk.bf16.gmra.mrb[16].mxu0 %vm603_vm0, %v2130_v59 }
  0x6b   : > { %865 = vmatprep.mubr.bf16.mxu0 %v2179_v0 }
  0x72   : > { %1994 = vmatmul.mubr.msk.bf16.gmra.mrb[20].mxu0 %vm603_vm0, %v2131_v62 }
  0x73   : > { %992 = vmatprep.mubr.bf16.mxu0 %v2179_v0 }
  0x7a   : > { %2005 = vmatmul.mubr.msk.bf16.vlgmr.msra.gmra.mrb[0].mxu0 %vm603_vm0, %v2138_v63 }
  0x7b   : > { %1002 = vmatprep.mubr.bf16.mxu0 %v2179_v0 }
  0x82   : > { %2006 = vmatmul.mubr.msk.bf16.gmra.mrb[4].mxu0 %vm603_vm0, %v2139_v1 }
  0x83   : > { %1012 = vmatprep.mubr.bf16.mxu0 %v2179_v0 }
  0x88   : > { %v1092_v6 = vpop.permute.xlu0 %1091  ;;  %v1188_v7 = vpop.permute.xlu1 %1187 }
  0x8a   : > { %2007 = vmatmul.mubr.msk.bf16.gmra.mrb[8].mxu0 %vm603_vm0, %v2140_v2 }
  0x8b   : > { %1022 = vmatprep.mubr.bf16.mxu0 %v2179_v0 }
  0x8c   : > { %v1097_v8 = vpop.permute.xlu0 %1096  ;;  %v1193_v9 = vpop.permute.xlu1 %1192 }
  0x90   : > { %v1102_v10 = vpop.permute.xlu0 %1101  ;;  %v1107_v11 = vpop.permute.xlu1 %1106 }
  0x92   : > { %2008 = vmatmul.mubr.msk.bf16.gmra.mrb[12].mxu0 %vm603_vm0, %v2141_v3 }
  0x93   : > { %1032 = vmatprep.mubr.bf16.mxu0 %v2179_v0 }
  0x94   : > { %v1198_v12 = vpop.permute.xlu0 %1197  ;;  %v1203_v13 = vpop.permute.xlu1 %1202 }
  0x98   : > { %v1112_v14 = vpop.permute.xlu0 %1111  ;;  %v1117_v18 = vpop.permute.xlu1 %1116 }
  0x9a   : > { %2009 = vmatmul.mubr.msk.bf16.gmra.mrb[16].mxu0 %vm603_vm0, %v2142_v4 }
  0x9b   : > { %1042 = vmatprep.mubr.bf16.mxu0 %v2179_v0 }
  0x9c   : > { %v1208_v27 = vpop.permute.xlu0 %1207  ;;  %v1213_v31 = vpop.permute.xlu1 %1212 }
  0xa0   : > { %v1122_v44 = vpop.permute.xlu0 %1121  ;;  %v1127_v48 = vpop.permute.xlu1 %1126 }
  0xa2   : > { %2010 = vmatmul.mubr.msk.bf16.gmra.mrb[20].mxu0 %vm603_vm0, %v2143_v5 }
  0xa4   : > { %v1218_v58 = vpop.permute.xlu0 %1217  ;;  %v1223_v2 = vpop.permute.xlu1 %1222 }
 0x14d   : > { %v994_v15 = vpop.f32.mrb[0].mxu0 }
 0x14e   : > { %v1149_v16 = vmul.f32 %v1092_v6, %v994_v15  ;;  %v996_v17 = vpop.f32.mrb[1].mxu0 }
 0x14f   : > { %v1150_v19 = vmul.f32 %v1092_v6, %v996_v17  ;;  %v998_v20 = vpop.f32.mrb[2].mxu0 }
 0x150   : > { %v1245_v21 = vadd.f32 %v1188_v7, %v1149_v16  ;;  %v1151_v22 = vmul.f32 %v1097_v8, %v998_v20  ;;  %v1000_v23 = vpop.f32.mrb[3].mxu0  ;;  %v1137_v16 = vpop.permute.xlu1 %1136 }
 0x151   : > { %v1152_v24 = vmul.f32 %v1097_v8, %v1000_v23  ;;  %v1246_v25 = vadd.f32 %v1188_v7, %v1150_v19 }
 0x152   : > { %v1247_v26 = vadd.f32 %v1193_v9, %v1151_v22  ;;  %v1269_v29 = vmax.f32 %v1245_v21, 0.0 }
 0x153   : > { %v1248_v28 = vadd.f32 %v1193_v9, %v1152_v24  ;;  %v1270_v33 = vmax.f32 %v1246_v25, 0.0  ;;  %v1132_v9 = vpop.permute.xlu0 %1131 }
 0x154   : > { %v1271_v30 = vmax.f32 %v1247_v26, 0.0 }
 0x155   : > { %v1004_v32 = vpop.f32.mrb[4].mxu0  ;;  %v1272_v34 = vmax.f32 %v1248_v28, 0.0 }
 0x156   : > { %v1153_v35 = vmul.f32 %v1102_v10, %v1004_v32  ;;  %v1006_v36 = vpop.f32.mrb[5].mxu0  ;;  %v1329_v37 = vpack.c.bf16 %v1271_v30, %v1269_v29  ;;  %v1233_v30 = vpop.permute.xlu1 %1232 }
 0x157   : > { %v1154_v38 = vmul.f32 %v1102_v10, %v1006_v36  ;;  %v1008_v39 = vpop.f32.mrb[6].mxu0  ;;  %v1330_v40 = vpack.c.bf16 %v1272_v34, %v1270_v33  ;;  %v1228_v26 = vpop.permute.xlu0 %1227 }
 0x158   : > { %v1249_v41 = vadd.f32 %v1198_v12, %v1153_v35  ;;  %v1155_v42 = vmul.f32 %v1107_v11, %v1008_v39  ;;  %v1010_v43 = vpop.f32.mrb[7].mxu0 }
 0x159   : > { %v1250_v45 = vadd.f32 %v1198_v12, %v1154_v38  ;;  %v1156_v46 = vmul.f32 %v1107_v11, %v1010_v43  ;;  %1496 = vmatprep.subr.bf16.mxu1 %v1330_v40 }
 0x15a   : > { %v1251_v47 = vadd.f32 %v1203_v13, %v1155_v42  ;;  %1497 = vmatpush1.bf16.msra.mxu1 %v1329_v37  ;;  %v1273_v50 = vmax.f32 %v1249_v41, 0.0 }
 0x15b   : > { %v1252_v49 = vadd.f32 %v1203_v13, %v1156_v46  ;;  %v1274_v52 = vmax.f32 %v1250_v45, 0.0  ;;  %v1142_v43 = vpop.permute.xlu0 %1141 }
 0x15c   : > { %v1275_v51 = vmax.f32 %v1251_v47, 0.0  ;;  %v1147_v47 = vpop.permute.xlu1 %1146 }
 0x15d   : > { %v1276_v53 = vmax.f32 %v1252_v49, 0.0  ;;  %v1014_v54 = vpop.f32.mrb[8].mxu0 }
 0x15e   : > { %v1157_v55 = vmul.f32 %v1112_v14, %v1014_v54  ;;  %v1016_v56 = vpop.f32.mrb[9].mxu0  ;;  %v1331_v57 = vpack.c.bf16 %v1275_v51, %v1273_v50 }
 0x15f   : > { %v1158_v59 = vmul.f32 %v1112_v14, %v1016_v56  ;;  %v1018_v60 = vpop.f32.mrb[10].mxu0  ;;  %v1332_v61 = vpack.c.bf16 %v1276_v53, %v1274_v52 }
 0x160   : > { %v1253_v62 = vadd.f32 %v1208_v27, %v1157_v55  ;;  %v1159_v63 = vmul.f32 %v1117_v18, %v1018_v60  ;;  %v1020_v1 = vpop.f32.mrb[11].mxu0 }
 0x161   : > { %v1254_v3 = vadd.f32 %v1208_v27, %v1158_v59  ;;  %v1160_v4 = vmul.f32 %v1117_v18, %v1020_v1  ;;  %1498 = vmatprep.subr.bf16.mxu1 %v1332_v61  ;;  %v1243_v1 = vpop.permute.xlu1 %1242 }
 0x162   : > { %v1255_v5 = vadd.f32 %v1213_v31, %v1159_v63  ;;  %1499 = vmatpush1.bf16.msra.mxu1 %v1331_v57  ;;  %v1277_v7 = vmax.f32 %v1253_v62, 0.0  ;;  %v1238_v57 = vpop.permute.xlu0 %1237 }
 0x163   : > { %v1256_v6 = vadd.f32 %v1213_v31, %v1160_v4  ;;  %v1278_v10 = vmax.f32 %v1254_v3, 0.0 }
 0x164   : > { %v1279_v8 = vmax.f32 %v1255_v5, 0.0 }
 0x165   : > { %v1280_v11 = vmax.f32 %v1256_v6, 0.0  ;;  %v1024_v12 = vpop.f32.mrb[12].mxu0 }
 0x166   : > { %v1161_v13 = vmul.f32 %v1122_v44, %v1024_v12  ;;  %v1026_v14 = vpop.f32.mrb[13].mxu0  ;;  %v1333_v15 = vpack.c.bf16 %v1279_v8, %v1277_v7  ;;  %v2144_v12 = vld [vmem:[%s2720_s8] sm:$0xff]  }
 0x167   : > { %v1162_v17 = vmul.f32 %v1122_v44, %v1026_v14  ;;  %v1028_v19 = vpop.f32.mrb[14].mxu0  ;;  %v1334_v20 = vpack.c.bf16 %v1280_v11, %v1278_v10  ;;  %v2146_v14 = vld [vmem:[%s2720_s8 + $0x10] sm:$0xff]  }
 0x168   : > { %v1257_v21 = vadd.f32 %v1218_v58, %v1161_v13  ;;  %v1163_v22 = vmul.f32 %v1127_v48, %v1028_v19  ;;  %v1030_v18 = vpop.f32.mrb[15].mxu0  ;;  %v2145_v13 = vld [vmem:[%s2720_s8 + $0x8] sm:$0xff]   ;;  %v2150_v19 = vld [vmem:[%s2720_s8 + $0x30] sm:$0xff]  }
 0x169   : > { %v1258_v23 = vadd.f32 %v1218_v58, %v1162_v17  ;;  %v1164_v24 = vmul.f32 %v1127_v48, %v1030_v18  ;;  %1500 = vmatprep.subr.bf16.mxu1 %v1334_v20  ;;  %v2149_v17 = vld [vmem:[%s2720_s8 + $0x28] sm:$0xff]   ;;  %v2518_v20 = vpop.permute.xlu1 %1436 }
 0x16a   : > { %v1259_v25 = vadd.f32 %v1223_v2, %v1163_v22  ;;  %1501 = vmatpush1.bf16.msra.mxu1 %v1333_v15  ;;  %v1281_v28 = vmax.f32 %v1257_v21, 0.0  ;;  %v2147_v15 = vld [vmem:[%s2720_s8 + $0x18] sm:$0xff]   ;;  %v2520_v21 = vpop.permute.xlu0 %1431 }
 0x16b   : > { %v1260_v27 = vadd.f32 %v1223_v2, %v1164_v24  ;;  %v1282_v31 = vmax.f32 %v1258_v23, 0.0 }
 0x16c   : > { %v1283_v29 = vmax.f32 %v1259_v25, 0.0 }
 0x16d   : > { %v1284_v32 = vmax.f32 %v1260_v27, 0.0  ;;  %v1034_v33 = vpop.f32.mrb[16].mxu0  ;;  %v1377_v18 = vpop.permute.xlu1 %1376 }
 0x16e   : > { %v1165_v34 = vmul.f32 %v1132_v9, %v1034_v33  ;;  %v1036_v35 = vpop.f32.mrb[17].mxu0  ;;  %v1335_v36 = vpack.c.bf16 %v1283_v29, %v1281_v28  ;;  %v1372_v24 = vpop.permute.xlu0 %1371 }
 0x16f   : > { %v1166_v37 = vmul.f32 %v1132_v9, %v1036_v35  ;;  %v1038_v38 = vpop.f32.mrb[18].mxu0  ;;  %v1336_v39 = vpack.c.bf16 %v1284_v32, %v1282_v31  ;;  %v2180_v35 = vmov 0.0  }
 0x170   : > { %v1261_v40 = vadd.f32 %v1228_v26, %v1165_v34  ;;  %v1167_v41 = vmul.f32 %v1137_v16, %v1038_v38  ;;  %v1040_v42 = vpop.f32.mrb[19].mxu0  ;;  %519 = vst.msk [vmem:[#allocation3] sm:$0xff] %vm518_vm2, %v2180_v35  ;;  %520 = vst.msk [vmem:[#allocation3 + $0x8] sm:$0xff] %vm518_vm2, %v2180_v35 }
 0x171   : > { %v1262_v44 = vadd.f32 %v1228_v26, %v1166_v37  ;;  %v1168_v45 = vmul.f32 %v1137_v16, %v1040_v42  ;;  %1502 = vmatprep.subr.bf16.mxu1 %v1336_v39  ;;  %v2148_v16 = vld [vmem:[%s2720_s8 + $0x20] sm:$0xff]   ;;  %v1387_v33 = vpop.permute.xlu1 %1386  ;;  %506 = vst.msk [vmem:[#allocation2] sm:$0xff] %vm505_vm4, %v2180_v35  ;;  %507 = vst.msk [vmem:[#allocation2 + $0x8] sm:$0xff] %vm505_vm4, %v2180_v35 }
 0x172   : > { %v1263_v46 = vadd.f32 %v1233_v30, %v1167_v41  ;;  %1503 = vmatpush1.bf16.msra.mxu1 %v1335_v36  ;;  %v1285_v49 = vmax.f32 %v1261_v40, 0.0  ;;  %v1382_v36 = vpop.permute.xlu0 %1381  ;;  %508 = vst.msk [vmem:[#allocation2 + $0x10] sm:$0xff] %vm505_vm4, %v2180_v35  ;;  %509 = vst.msk [vmem:[#allocation2 + $0x18] sm:$0xff] %vm505_vm4, %v2180_v35 }
 0x173   : > { %v1264_v48 = vadd.f32 %v1233_v30, %v1168_v45  ;;  %v1286_v51 = vmax.f32 %v1262_v44, 0.0  ;;  %510 = vst.msk [vmem:[#allocation2 + $0x20] sm:$0xff] %vm505_vm4, %v2180_v35  ;;  %511 = vst.msk [vmem:[#allocation2 + $0x28] sm:$0xff] %vm505_vm4, %v2180_v35 }
 0x174   : > { %v1287_v50 = vmax.f32 %v1263_v46, 0.0  ;;  %512 = vst.msk [vmem:[#allocation2 + $0x30] sm:$0xff] %vm505_vm4, %v2180_v35  ;;  %513 = vst.msk [vmem:[#allocation2 + $0x38] sm:$0xff] %vm505_vm4, %v2180_v35 }
 0x175   : > { %v1288_v52 = vmax.f32 %v1264_v48, 0.0  ;;  %v1044_v53 = vpop.f32.mrb[20].mxu0  ;;  %v1397_v46 = vpop.permute.xlu1 %1396  ;;  %514 = vst.msk [vmem:[#allocation2 + $0x40] sm:$0xff] %vm505_vm4, %v2180_v35  ;;  %515 = vst.msk [vmem:[#allocation2 + $0x48] sm:$0xff] %vm505_vm4, %v2180_v35 }
 0x176   : > { %v1169_v54 = vmul.f32 %v1142_v43, %v1044_v53  ;;  %v1046_v55 = vpop.f32.mrb[21].mxu0  ;;  %v1337_v56 = vpack.c.bf16 %v1287_v50, %v1285_v49  ;;  %v1392_v48 = vpop.permute.xlu0 %1391  ;;  %516 = vst.msk [vmem:[#allocation2 + $0x50] sm:$0xff] %vm505_vm4, %v2180_v35  ;;  %517 = vst.msk [vmem:[#allocation2 + $0x58] sm:$0xff] %vm505_vm4, %v2180_v35 }
 0x177   : > { %v1170_v58 = vmul.f32 %v1142_v43, %v1046_v55  ;;  %v1048_v59 = vpop.f32.mrb[22].mxu0  ;;  %v1338_v60 = vpack.c.bf16 %v1288_v52, %v1286_v51 }
 0x178   : > { %v1265_v61 = vadd.f32 %v1238_v57, %v1169_v54  ;;  %v1171_v62 = vmul.f32 %v1147_v47, %v1048_v59  ;;  %v1050_v63 = vpop.f32.mrb[23].mxu0 }
 0x179   : > { %v1266_v2 = vadd.f32 %v1238_v57, %v1170_v58  ;;  %v1172_v3 = vmul.f32 %v1147_v47, %v1050_v63  ;;  %1504 = vmatprep.subr.bf16.mxu1 %v1338_v60  ;;  %v1407_v58 = vpop.permute.xlu1 %1406 }
 0x17a   : > { %v1267_v4 = vadd.f32 %v1243_v1, %v1171_v62  ;;  %1505 = vmatpush1.bf16.msra.mxu1 %v1337_v56  ;;  %v1289_v6 = vmax.f32 %v1265_v61, 0.0  ;;  %v1402_v60 = vpop.permute.xlu0 %1401 }
 0x17b   : > { %v1268_v5 = vadd.f32 %v1243_v1, %v1172_v3  ;;  %v1290_v8 = vmax.f32 %v1266_v2, 0.0 }
 0x17c   : > { %v1291_v7 = vmax.f32 %v1267_v4, 0.0 }
 0x17d   : > { %v1292_v9 = vmax.f32 %v1268_v5, 0.0 }
 0x17e   : > { %v1339_v10 = vpack.c.bf16 %v1291_v7, %v1289_v6  ;;  %v1417_v7 = vpop.permute.xlu1 %1416 }
 0x17f   : > { %v1340_v11 = vpack.c.bf16 %v1292_v9, %v1290_v8  ;;  %v1412_v9 = vpop.permute.xlu0 %1411 }
 0x181   : > { %1506 = vmatprep.subr.bf16.mxu1 %v1340_v11 }
 0x182   : > { %1507 = vmatpush1.bf16.msra.mxu1 %v1339_v10 }
 0x185   : > { %2018 = vmatmul.mubr.msk.bf16.vlgmr.msra.gmra.mrb[0].mxu1 %vm1474_vm1, %v2144_v12 }
 0x186   : > { %1538 = vmatprep.mubr.bf16.mxu1 %v2179_v0 }
 0x18d   : > { %2019 = vmatmul.mubr.msk.bf16.gmra.mrb[4].mxu1 %vm1474_vm1, %v2145_v13 }
 0x18e   : > { %1548 = vmatprep.mubr.bf16.mxu1 %v2179_v0 }
 0x195   : > { %2020 = vmatmul.mubr.msk.bf16.gmra.mrb[8].mxu1 %vm1474_vm1, %v2146_v14 }
 0x196   : > { %1558 = vmatprep.mubr.bf16.mxu1 %v2179_v0 }
 0x19d   : > { %2021 = vmatmul.mubr.msk.bf16.gmra.mrb[12].mxu1 %vm1474_vm1, %v2147_v15 }
 0x19e   : > { %1568 = vmatprep.mubr.bf16.mxu1 %v2179_v0 }
 0x1a5   : > { %2022 = vmatmul.mubr.msk.bf16.gmra.mrb[16].mxu1 %vm1474_vm1, %v2148_v16 }
 0x1a6   : > { %1578 = vmatprep.mubr.bf16.mxu1 %v2179_v0 }
 0x1ad   : > { %2023 = vmatmul.mubr.msk.bf16.gmra.mrb[20].mxu1 %vm1474_vm1, %v2149_v17 }
 0x1ae   : > { %1588 = vmatprep.mubr.bf16.mxu1 %v2179_v0 }
 0x1b5   : > { %2024 = vmatmul.mubr.msk.bf16.gmra.mrb[24].mxu1 %vm1474_vm1, %v2150_v19 }
 0x258   : > { %v1530_v22 = vpop.f32.mrb[0].mxu1 }
 0x259   : > { %v1532_v23 = vpop.f32.mrb[1].mxu1  ;;  %v2522_v26 = vadd.f32 %v1530_v22, %v1372_v24  ;;  %v1427_v22 = vpop.permute.xlu1 %1426 }
 0x25a   : > { %v1534_v25 = vpop.f32.mrb[2].mxu1  ;;  %v1533_v28 = vadd.f32 %v1532_v23, %v1372_v24  ;;  %v1422_v23 = vpop.permute.xlu0 %1421 }
 0x25b   : > { %v2524_v27 = vadd.f32 %v1534_v25, %v1377_v18  ;;  %v1536_v0 = vpop.f32.mrb[3].mxu1 }
 0x25c   : > { %v1537_v29 = vadd.f32 %v1536_v0, %v1377_v18 }
 0x25d   : > { %v1663_v30 = vpack.c.bf16 %v2524_v27, %v2522_v26  ;;  %v1638_v26 = vld [vmem:[#allocation3] sm:$0xff]  ;;  %v1639_v27 = vld [vmem:[#allocation3 + $0x8] sm:$0xff] }
 0x25e   : > { %v1664_v31 = vpack.c.bf16 %v1537_v29, %v1533_v28 }
 0x260   : > { %v1540_v32 = vpop.f32.mrb[4].mxu1  ;;  %1709 = vmatprep.mubr.bf16.mxu1 %v1664_v31 }
 0x261   : > { %v1542_v34 = vpop.f32.mrb[5].mxu1  ;;  %v2532_v38 = vadd.f32 %v1540_v32, %v1382_v36 }
 0x262   : > { %v1544_v37 = vpop.f32.mrb[6].mxu1  ;;  %v2536_v41 = vadd.f32 %v1542_v34, %v1382_v36 }
 0x263   : > { %v2534_v39 = vadd.f32 %v1544_v37, %v1387_v33  ;;  %v1546_v40 = vpop.f32.mrb[7].mxu1 }
 0x264   : > { %v2538_v42 = vadd.f32 %v1546_v40, %v1387_v33 }
 0x265   : > { %v1665_v43 = vpack.c.bf16 %v2534_v39, %v2532_v38 }
 0x266   : > { %v1666_v44 = vpack.c.bf16 %v2538_v42, %v2536_v41 }
 0x268   : > { %v1550_v45 = vpop.f32.mrb[8].mxu1 }
 0x269   : > { %v1552_v47 = vpop.f32.mrb[9].mxu1  ;;  %v2544_v50 = vadd.f32 %v1550_v45, %v1392_v48 }
 0x26a   : > { %v1554_v49 = vpop.f32.mrb[10].mxu1  ;;  %v2548_v53 = vadd.f32 %v1552_v47, %v1392_v48 }
 0x26b   : > { %v2546_v51 = vadd.f32 %v1554_v49, %v1397_v46  ;;  %v1556_v52 = vpop.f32.mrb[11].mxu1 }
 0x26c   : > { %v2550_v54 = vadd.f32 %v1556_v52, %v1397_v46 }
 0x26d   : > { %v1667_v55 = vpack.c.bf16 %v2546_v51, %v2544_v50  ;;  %v1652_v50 = vld [vmem:[#allocation2 + $0x8] sm:$0xff] }
 0x26e   : > { %v1668_v56 = vpack.c.bf16 %v2550_v54, %v2548_v53 }
 0x270   : > { %v1560_v57 = vpop.f32.mrb[12].mxu1 }
 0x271   : > { %v1562_v59 = vpop.f32.mrb[13].mxu1  ;;  %v2556_v62 = vadd.f32 %v1560_v57, %v1402_v60 }
 0x272   : > { %v1564_v61 = vpop.f32.mrb[14].mxu1  ;;  %v2560_v2 = vadd.f32 %v1562_v59, %v1402_v60 }
 0x273   : > { %v2558_v63 = vadd.f32 %v1564_v61, %v1407_v58  ;;  %v1566_v1 = vpop.f32.mrb[15].mxu1 }
 0x274   : > { %v2562_v3 = vadd.f32 %v1566_v1, %v1407_v58 }
 0x275   : > { %v1669_v4 = vpack.c.bf16 %v2558_v63, %v2556_v62  ;;  %v1653_v62 = vld [vmem:[#allocation2 + $0x10] sm:$0xff] }
 0x276   : > { %v1670_v5 = vpack.c.bf16 %v2562_v3, %v2560_v2  ;;  %v1654_v2 = vld [vmem:[#allocation2 + $0x18] sm:$0xff] }
 0x278   : > { %v1570_v6 = vpop.f32.mrb[16].mxu1 }
 0x279   : > { %v1572_v8 = vpop.f32.mrb[17].mxu1  ;;  %v2568_v11 = vadd.f32 %v1570_v6, %v1412_v9 }
 0x27a   : > { %v1574_v10 = vpop.f32.mrb[18].mxu1  ;;  %v2572_v14 = vadd.f32 %v1572_v8, %v1412_v9 }
 0x27b   : > { %v2570_v12 = vadd.f32 %v1574_v10, %v1417_v7  ;;  %v1576_v13 = vpop.f32.mrb[19].mxu1 }
 0x27c   : > { %v2574_v15 = vadd.f32 %v1576_v13, %v1417_v7 }
 0x27d   : > { %v1671_v16 = vpack.c.bf16 %v2570_v12, %v2568_v11 }
 0x27e   : > { %v1672_v17 = vpack.c.bf16 %v2574_v15, %v2572_v14 }
 0x280   : > { %v1580_v19 = vpop.f32.mrb[20].mxu1 }
 0x281   : > { %v1582_v18 = vpop.f32.mrb[21].mxu1  ;;  %v2580_v25 = vadd.f32 %v1580_v19, %v1422_v23 }
 0x282   : > { %v1584_v24 = vpop.f32.mrb[22].mxu1  ;;  %v2584_v29 = vadd.f32 %v1582_v18, %v1422_v23 }
 0x283   : > { %v2582_v0 = vadd.f32 %v1584_v24, %v1427_v22  ;;  %v1586_v28 = vpop.f32.mrb[23].mxu1 }
 0x284   : > { %v2586_v31 = vadd.f32 %v1586_v28, %v1427_v22 }
 0x285   : > { %v1673_v32 = vpack.c.bf16 %v2582_v0, %v2580_v25  ;;  %v1656_v25 = vld [vmem:[#allocation2 + $0x28] sm:$0xff] }
 0x286   : > { %v1674_v33 = vpack.c.bf16 %v2586_v31, %v2584_v29 }
 0x288   : > { %v1590_v34 = vpop.f32.mrb[24].mxu1 }
 0x289   : > { %v1591_v36 = vadd.f32 %v1590_v34, %v2520_v21  ;;  %v1592_v37 = vpop.f32.mrb[25].mxu1 }
 0x28a   : > { %v1593_v40 = vadd.f32 %v1592_v37, %v2520_v21  ;;  %v1594_v45 = vpop.f32.mrb[26].mxu1 }
 0x28b   : > { %v1595_v46 = vadd.f32 %v1594_v45, %v2518_v20  ;;  %v1596_v47 = vpop.f32.mrb[27].mxu1  ;;  %v1599_v49 = vmul.f32 %v1591_v36, %v1591_v36 }
 0x28c   : > { %v1597_v48 = vadd.f32 %v1596_v47, %v2518_v20  ;;  %v1600_v57 = vmul.f32 %v1593_v40, %v1593_v40  ;;  %v1625_v20 = vlaneseq }
 0x28d   : > { %v1601_v52 = vmul.f32 %v1595_v46, %v1595_v46 }
 0x28e   : > { %v1602_v58 = vmul.f32 %v1597_v48, %v1597_v48  ;;  %v1626_v28 = vshrl.u32 %v1625_v20, 7  ;;  %v1660_v20 = vld [vmem:[#allocation2 + $0x48] sm:$0xff] }
 0x28f   : > { %v1603_v59 = vadd.f32 %v1601_v52, %v1599_v49 }
 0x290   : > { %v1610_v60 = vadd.f32 %v1602_v58, %v1600_v57  ;;  %v1627_v34 = vadd.s32 8, %v1626_v28 }
 0x291   : > { %v1604_v61 = vrot.slane %v1603_v59, 4 }
 0x292   : > { %v1611_v1 = vrot.slane %v1610_v60, 4  ;;  %vm1629_vm3 = vcmp.eq.s32.totalorder %v1627_v34, 12 }
 0x293   : > { %v1605_v6 = vadd.f32 %v1604_v61, %v1603_v59 }
 0x294   : > { %v1612_v7 = vadd.f32 %v1611_v1, %v1610_v60 }
 0x295   : > { %v1606_v8 = vrot.slane %v1605_v6, 2 }
 0x296   : > { %v1613_v9 = vrot.slane %v1612_v7, 2 }
 0x297   : > { %v1607_v10 = vadd.f32 %v1606_v8, %v1605_v6 }
 0x298   : > { %v1614_v21 = vadd.f32 %v1613_v9, %v1612_v7  ;;  %v1658_v7 = vld [vmem:[#allocation2 + $0x38] sm:$0xff] }
 0x299   : > { %v1608_v13 = vrot.slane %v1607_v10, 1 }
 0x29a   : > { %v1615_v19 = vrot.slane %v1614_v21, 1 }
 0x29b   : > { %v1609_v22 = vadd.f32 %v1608_v13, %v1607_v10 }
 0x29c   : > { %v1616_v18 = vadd.f32 %v1615_v19, %v1614_v21 }
 0x29d   : > { %v1617_v23 = vadd.f32 1e-12, %v1609_v22 }
 0x29e   : > { %v1618_v24 = vadd.f32 1e-12, %v1616_v18  ;;  %v1659_v18 = vld [vmem:[#allocation2 + $0x40] sm:$0xff] }
 0x29f   : > { %2151 = vrsqrt.f32 %v1617_v23 }
 0x2a0   : > { %2153 = vrsqrt.f32 %v1618_v24 }
 0x2a9   : > { %v2152_v37 = vpop.eup %2151 }
 0x2aa   : > { %v2154_v45 = vpop.eup %2153  ;;  %v1623_v47 = vmul.f32 %v2152_v37, %v1595_v46  ;;  %v1621_v49 = vmul.f32 %v2152_v37, %v1591_v36  ;;  %v1657_v46 = vld [vmem:[#allocation2 + $0x30] sm:$0xff] }
 0x2ab   : > { %v1624_v52 = vmul.f32 %v2154_v45, %v1597_v48  ;;  %v1622_v57 = vmul.f32 %v2154_v45, %v1593_v40 }
 0x2ac   : > { %v1632_v58 = vsel %vm1629_vm3, 1.0, %v1623_v47 }
 0x2ad   : > { %v1633_v59 = vsel %vm1629_vm3, 1.0, %v1624_v52  ;;  %v1640_v60 = vadd.f32 %v1622_v57, %v1621_v49  ;;  %v1675_v61 = vpack.c.bf16 %v1632_v58, %v1621_v49  ;;  %v1661_v52 = vld [vmem:[#allocation2 + $0x50] sm:$0xff] }
 0x2ae   : > { %v1676_v1 = vpack.c.bf16 %v1633_v59, %v1622_v57  ;;  %v1643_v6 = vadd.f32 %v1633_v59, %v1632_v58  ;;  %v1662_v58 = vld [vmem:[#allocation2 + $0x58] sm:$0xff] }
 0x2af   : > { %1641 = vadd.xlane.f32.xlu0 %v1640_v60 }
 0x2b0   : > { %1677 = vmatprep.subr.bf16.mxu1 %v1676_v1  ;;  %1644 = vadd.xlane.f32.xlu1 %v1643_v6 }
 0x2b1   : > { %1678 = vmatpush1.bf16.xpose.msra.mxu1 %v1675_v61 }
 0x2b8   : > { %1710 = vmatmul.mubr.bf16.vlgmr.msra.gmra.mrb[28].mxu1 %v1663_v30 }
 0x2b9   : > { %1717 = vmatprep.mubr.bf16.mxu1 %v1666_v44 }
 0x2c0   : > { %1718 = vmatmul.mubr.bf16.gmra.mrb[32].mxu1 %v1665_v43  ;;  %v1651_v43 = vld [vmem:[#allocation2] sm:$0xff] }
 0x2c1   : > { %1725 = vmatprep.mubr.bf16.mxu1 %v1668_v56 }
 0x2c8   : > { %1726 = vmatmul.mubr.bf16.gmra.mrb[36].mxu1 %v1667_v55 }
 0x2c9   : > { %1733 = vmatprep.mubr.bf16.mxu1 %v1670_v5 }
 0x2d0   : > { %1734 = vmatmul.mubr.bf16.gmra.mrb[40].mxu1 %v1669_v4 }
 0x2d1   : > { %1741 = vmatprep.mubr.bf16.mxu1 %v1672_v17 }
 0x2d8   : > { %1742 = vmatmul.mubr.bf16.gmra.mrb[44].mxu1 %v1671_v16  ;;  %v1655_v16 = vld [vmem:[#allocation2 + $0x20] sm:$0xff] }
 0x2d9   : > { %1749 = vmatprep.mubr.bf16.mxu1 %v1674_v33 }
 0x2e0   : > { %1750 = vmatmul.mubr.bf16.gmra.mrb[48].mxu1 %v1673_v32 }
 0x33c   : > { %v1642_v30 = vpop.xlane.xlu0 %1641 }
 0x33d   : > { %v1646_v35 = vadd.f32 %v1642_v30, %v1638_v26  ;;  %v1645_v38 = vpop.xlane.xlu1 %1644 }
 0x33e   : > { %v1647_v39 = vadd.f32 %v1645_v38, %v1639_v27 }
 0x33f   : > { %1649 = vst.msk [vmem:[#allocation3] sm:$0xff] %vm518_vm2, %v1646_v35 }
 0x340   : > { %1650 = vst.msk [vmem:[#allocation3 + $0x8] sm:$0xff] %vm518_vm2, %v1647_v39 }
 0x346   : > { %v1807_v41 = vld [vmem:[#allocation3] sm:$0xff] }
 0x347   : > { %1809 = vst.msk [vmem:[%s499_s28] sm:$0xff] %vm518_vm2, %v1807_v41  ;;  %v1808_v42 = vld [vmem:[#allocation3 + $0x8] sm:$0xff] }
 0x348   : > { %1810 = vst.msk [vmem:[%s499_s28 + $0x8] sm:$0xff] %vm518_vm2, %v1808_v42 }
 0x38b   : > { %v1711_v44 = vpop.f32.mrb[28].mxu1 }
 0x38c   : > { %v1758_v51 = vadd.f32 %v1711_v44, %v1651_v43  ;;  %v1713_v53 = vpop.f32.mrb[29].mxu1 }
 0x38d   : > { %v1714_v54 = vpop.f32.mrb[30].mxu1 }
 0x38e   : > { %1771 = vst.msk [vmem:[#allocation2] sm:$0xff] %vm505_vm4, %v1758_v51  ;;  %v1759_v55 = vadd.f32 %v1714_v54, %v1652_v50  ;;  %v1716_v56 = vpop.f32.mrb[31].mxu1 }
 0x390   : > { %1772 = vst.msk [vmem:[#allocation2 + $0x8] sm:$0xff] %vm505_vm4, %v1759_v55 }
 0x393   : > { %v1719_v63 = vpop.f32.mrb[32].mxu1 }
 0x394   : > { %v1760_v3 = vadd.f32 %v1719_v63, %v1653_v62  ;;  %v1721_v4 = vpop.f32.mrb[33].mxu1 }
 0x395   : > { %v1783_v5 = vld [vmem:[#allocation2] sm:$0xff]  ;;  %v1722_v11 = vpop.f32.mrb[34].mxu1 }
 0x396   : > { %1795 = vst.msk [vmem:[%s2667_s14] sm:$0xff] %vm505_vm4, %v1783_v5  ;;  %1773 = vst.msk [vmem:[#allocation2 + $0x10] sm:$0xff] %vm505_vm4, %v1760_v3  ;;  %v1761_v12 = vadd.f32 %v1722_v11, %v1654_v2  ;;  %v1724_v14 = vpop.f32.mrb[35].mxu1 }
 0x397   : > { %v1784_v15 = vld [vmem:[#allocation2 + $0x8] sm:$0xff] }
 0x398   : > { %1796 = vst.msk [vmem:[%s2667_s14 + $0x8] sm:$0xff] %vm505_vm4, %v1784_v15  ;;  %1774 = vst.msk [vmem:[#allocation2 + $0x18] sm:$0xff] %vm505_vm4, %v1761_v12 }
 0x39b   : > { %v1727_v17 = vpop.f32.mrb[36].mxu1 }
 0x39c   : > { %v1762_v0 = vadd.f32 %v1727_v17, %v1655_v16  ;;  %v1729_v29 = vpop.f32.mrb[37].mxu1 }
 0x39d   : > { %v1785_v31 = vld [vmem:[#allocation2 + $0x10] sm:$0xff]  ;;  %v1730_v32 = vpop.f32.mrb[38].mxu1 }
 0x39e   : > { %1797 = vst.msk [vmem:[%s2667_s14 + $0x10] sm:$0xff] %vm505_vm4, %v1785_v31  ;;  %1775 = vst.msk [vmem:[#allocation2 + $0x20] sm:$0xff] %vm505_vm4, %v1762_v0  ;;  %v1763_v33 = vadd.f32 %v1730_v32, %v1656_v25  ;;  %v1732_v36 = vpop.f32.mrb[39].mxu1 }
 0x39f   : > { %v1786_v40 = vld [vmem:[#allocation2 + $0x18] sm:$0xff] }
 0x3a0   : > { %1798 = vst.msk [vmem:[%s2667_s14 + $0x18] sm:$0xff] %vm505_vm4, %v1786_v40  ;;  %1776 = vst.msk [vmem:[#allocation2 + $0x28] sm:$0xff] %vm505_vm4, %v1763_v33 }
 0x3a3   : > { %v1735_v48 = vpop.f32.mrb[40].mxu1 }
 0x3a4   : > { %v1764_v8 = vadd.f32 %v1735_v48, %v1657_v46  ;;  %v1737_v9 = vpop.f32.mrb[41].mxu1 }
 0x3a5   : > { %v1787_v10 = vld [vmem:[#allocation2 + $0x20] sm:$0xff]  ;;  %v1738_v21 = vpop.f32.mrb[42].mxu1 }
 0x3a6   : > { %1799 = vst.msk [vmem:[%s2667_s14 + $0x20] sm:$0xff] %vm505_vm4, %v1787_v10  ;;  %1777 = vst.msk [vmem:[#allocation2 + $0x30] sm:$0xff] %vm505_vm4, %v1764_v8  ;;  %v1765_v13 = vadd.f32 %v1738_v21, %v1658_v7  ;;  %v1740_v19 = vpop.f32.mrb[43].mxu1 }
 0x3a7   : > { %v1788_v22 = vld [vmem:[#allocation2 + $0x28] sm:$0xff] }
 0x3a8   : > { %1800 = vst.msk [vmem:[%s2667_s14 + $0x28] sm:$0xff] %vm505_vm4, %v1788_v22  ;;  %1778 = vst.msk [vmem:[#allocation2 + $0x38] sm:$0xff] %vm505_vm4, %v1765_v13 }
 0x3ab   : > { %v1743_v23 = vpop.f32.mrb[44].mxu1 }
 0x3ac   : > { %v1766_v24 = vadd.f32 %v1743_v23, %v1659_v18  ;;  %v1745_v28 = vpop.f32.mrb[45].mxu1 }
 0x3ad   : > { %v1789_v34 = vld [vmem:[#allocation2 + $0x30] sm:$0xff]  ;;  %v1746_v37 = vpop.f32.mrb[46].mxu1 }
 0x3ae   : > { %1801 = vst.msk [vmem:[%s2667_s14 + $0x30] sm:$0xff] %vm505_vm4, %v1789_v34  ;;  %1779 = vst.msk [vmem:[#allocation2 + $0x40] sm:$0xff] %vm505_vm4, %v1766_v24  ;;  %v1767_v45 = vadd.f32 %v1746_v37, %v1660_v20  ;;  %v1748_v47 = vpop.f32.mrb[47].mxu1 }
 0x3af   : > { %v1790_v49 = vld [vmem:[#allocation2 + $0x38] sm:$0xff] }
 0x3b0   : > { %1802 = vst.msk [vmem:[%s2667_s14 + $0x38] sm:$0xff] %vm505_vm4, %v1790_v49  ;;  %1780 = vst.msk [vmem:[#allocation2 + $0x48] sm:$0xff] %vm505_vm4, %v1767_v45 }
 0x3b3   : > { %v1751_v57 = vpop.f32.mrb[48].mxu1 }
 0x3b4   : > { %v1768_v59 = vadd.f32 %v1751_v57, %v1661_v52  ;;  %v1753_v60 = vpop.f32.mrb[49].mxu1 }
 0x3b5   : > { %v1791_v61 = vld [vmem:[#allocation2 + $0x40] sm:$0xff]  ;;  %v1754_v1 = vpop.f32.mrb[50].mxu1 }
 0x3b6   : > { %1803 = vst.msk [vmem:[%s2667_s14 + $0x40] sm:$0xff] %vm505_vm4, %v1791_v61  ;;  %1781 = vst.msk [vmem:[#allocation2 + $0x50] sm:$0xff] %vm505_vm4, %v1768_v59  ;;  %v1769_v6 = vadd.f32 %v1754_v1, %v1662_v58  ;;  %v1756_v26 = vpop.f32.mrb[51].mxu1 }
 0x3b7   : > { %v1792_v27 = vld [vmem:[#allocation2 + $0x48] sm:$0xff] }
 0x3b8   : > { %1804 = vst.msk [vmem:[%s2667_s14 + $0x48] sm:$0xff] %vm505_vm4, %v1792_v27  ;;  %1782 = vst.msk [vmem:[#allocation2 + $0x58] sm:$0xff] %vm505_vm4, %v1769_v6 }
 0x3bd   : > { %v1793_v30 = vld [vmem:[#allocation2 + $0x50] sm:$0xff] }
 0x3be   : > { %1805 = vst.msk [vmem:[%s2667_s14 + $0x50] sm:$0xff] %vm505_vm4, %v1793_v30 }
 0x3bf   : > { %v1794_v35 = vld [vmem:[#allocation2 + $0x58] sm:$0xff] }
 0x3c0   : > { %1806 = vst.msk [vmem:[%s2667_s14 + $0x58] sm:$0xff] %vm505_vm4, %v1794_v35 }
 0x3c1 PF: > { %s22_s19 = sadd.s32 1, %s2177_s19   ;;  %s2724_s17 = smov %s2173_s18 }
 0x3c2   : > { %p19_p5 = scmp.ge.s32.totalorder %s22_s19, 4   ;;  %s2725_s18 = smov %s2727_s20 }
 0x3c4   :  { %21 = sbr.rel (!%p19_p5) target bundleno = 2 (0x2), region = 112 }

</bundles_post_ra>
